<compile_context>
chip_gen: v6e
topology: v6e:2x2x1
jax: 0.10.0
libtpu: 0.0.40
codegen_flags: <defaults>
</compile_context>

<pallas_src>
import math

import jax
import jax.numpy as jnp
from jax.experimental import pallas as pl
from jax.experimental.pallas import tpu as pltpu

# Small, module-consistent shapes.
B, S, D = 2, 8, 32           # batch (documents), n_sents, d_model
HEADS = 4                    # attention heads (dim_per_head = 8)
D_FF = 64                    # d_ff
N_LAYERS = 2                 # num_inter_layers
EPS = 1e-6
NEG_INF = 1e18
VECW = 3 * D                 # padded lane width of the per-layer vector slab

# Row indices inside the per-layer vector slab.
_LN1_G, _LN1_B, _BQKV, _BO, _FFN_G, _FFN_B, _B1, _B2 = range(8)
# Row indices inside the final-head slab.
_FIN_G, _FIN_B, _WOUT, _BOUT = range(4)


def _layer_norm(v, g, b):
    mu = jnp.mean(v, axis=-1, keepdims=True)
    var = jnp.mean((v - mu) ** 2, axis=-1, keepdims=True)
    return (v - mu) * jax.lax.rsqrt(var + EPS) * g + b


def _gelu(x):
    # BertSum's tanh-approximation GELU (f32, EUP tanh).
    return 0.5 * x * (1.0 + jnp.tanh(math.sqrt(2.0 / math.pi) * (x + 0.044715 * x ** 3)))


def ext_transformer_encoder_kernel(
    x_ref, mask_ref, mask_lane_ref, pe_ref,
    attn_w_ref, ffn_w_ref, vec_ref, head_ref,
    scores_ref,
):
    db, s_len, d = x_ref.shape                     # per-grid-step document block
    dh = d // HEADS
    rows = db * s_len
    mx = jnp.bfloat16                              # MXU feed dtype; VPU/EUP math stays f32

    m = mask_ref[...]                              # (db, S), 1.0 = real sentence
    # top_vecs*mask + pos_emb, then flatten to (rows, D) so every projection is 2-D.
    x = (x_ref[...] * m[:, :, None] + pe_ref[...][None, :, :]).reshape(rows, d)

    # Hoisted additive key-padding mask: 0 for valid keys, -1e18 for padding.
    mask_add = ((m - 1.0) * NEG_INF)[:, None, :]   # (db, 1, S)

    for l in range(N_LAYERS):
        # --- per-layer parameter views (tiny full-slab loads + static slices) ---
        attn_w = attn_w_ref[l]                     # (D, 4D) bf16
        wqkv = attn_w[:, 0:3 * d]                  # (D, 3D)  q-part pre-scaled
        wo = attn_w[:, 3 * d:4 * d]                # (D, D)
        ffn_w = ffn_w_ref[l]                       # (D + D_FF, D_FF) bf16
        w1 = ffn_w[0:d, :]                         # (D, D_FF)
        w2 = ffn_w[d:d + D_FF, 0:d]                # (D_FF, D)
        vec = vec_ref[l]                           # (8, 3D) f32
        ln1_g = vec[_LN1_G:_LN1_G + 1, 0:d]
        ln1_b = vec[_LN1_B:_LN1_B + 1, 0:d]
        bqkv = vec[_BQKV:_BQKV + 1, :]             # (1, 3D), q-part pre-scaled
        bo = vec[_BO:_BO + 1, 0:d]
        ffn_g = vec[_FFN_G:_FFN_G + 1, 0:d]
        ffn_b = vec[_FFN_B:_FFN_B + 1, 0:d]
        b1 = vec[_B1:_B1 + 1, 0:D_FF]
        b2 = vec[_B2:_B2 + 1, 0:d]

        # ---- self-attention sub-layer (layer 0 skips the pre-LayerNorm) ----
        x_n = x if l == 0 else _layer_norm(x, ln1_g, ln1_b)

        # Fused Q|K|V projection: one N=3D MXU matmul (scale folded into wq/bq).
        qkv = jnp.dot(x_n.astype(mx), wqkv, preferred_element_type=jnp.float32) + bqkv
        qkv3 = qkv.reshape(db, s_len, 3 * d)       # major-dim split only (layout-trivial)

        ctx_heads = []
        for h in range(HEADS):                     # static 4-iteration unroll
            lo = h * dh
            qh = qkv3[:, :, lo:lo + dh].astype(mx)
            kh = qkv3[:, :, d + lo:d + lo + dh].astype(mx)
            vh = qkv3[:, :, 2 * d + lo:2 * d + lo + dh].astype(mx)
            s_h = jnp.einsum("bqd,bkd->bqk", qh, kh,
                             preferred_element_type=jnp.float32) + mask_add
            # Max-subtraction keeps fully-padded rows finite (uniform softmax, like torch);
            # their scores are zeroed by the output mask anyway.
            s_h = s_h - jnp.max(s_h, axis=-1, keepdims=True)
            p_h = jnp.exp(s_h)
            p_h = p_h * pl.reciprocal(jnp.sum(p_h, axis=-1, keepdims=True), approx=True)
            ctx_heads.append(jnp.einsum("bqk,bkd->bqd", p_h.astype(mx), vh,
                                        preferred_element_type=jnp.float32))

        # Concat heads along the feature axis -> ONE K=D output projection.
        ctx = jnp.concatenate(ctx_heads, axis=-1).reshape(rows, d)
        attn_out = jnp.dot(ctx.astype(mx), wo, preferred_element_type=jnp.float32) + bo
        x = attn_out + x                           # dropout(context) + inputs (eval mode)

        # ---- position-wise feed-forward (pre-LN, GELU, residual) ----
        x_ff = _layer_norm(x, ffn_g, ffn_b)
        inter = _gelu(jnp.dot(x_ff.astype(mx), w1,
                              preferred_element_type=jnp.float32) + b1)
        out = jnp.dot(inter.astype(mx), w2, preferred_element_type=jnp.float32) + b2
        x = out + x

    # ---- final LayerNorm + scoring head (lane-dense epilogue) ----
    fin_g = head_ref[_FIN_G:_FIN_G + 1, :]
    fin_b = head_ref[_FIN_B:_FIN_B + 1, :]
    wout = head_ref[_WOUT:_WOUT + 1, :]            # (1, D)
    bout = head_ref[_BOUT:_BOUT + 1, 0:1]          # (1, 1)
    x = _layer_norm(x, fin_g, fin_b)               # (rows, D), f32
    # wout @ x^T produces logits already lane-major: (1, rows). Kept in f32 (scoring head).
    logits = jnp.dot(wout, x.T, preferred_element_type=jnp.float32) + bout
    m_lane = mask_lane_ref[0]                      # (1, rows) lane-major mask
    # Exact sigmoid (no approx reciprocal) to track the torch reference closely.
    scores = m_lane / (1.0 + jnp.exp(-logits))     # (1, rows)
    scores_ref[...] = scores.reshape(1, 1, rows)   # lane-dense flat store


def make_pe(max_len, dim):
    position = jnp.arange(max_len, dtype=jnp.float32)[:, None]
    div_term = jnp.exp(jnp.arange(0, dim, 2, dtype=jnp.float32)
                       * -(math.log(10000.0) / dim))
    pe = jnp.zeros((max_len, dim), jnp.float32)
    pe = pe.at[:, 0::2].set(jnp.sin(position * div_term))
    pe = pe.at[:, 1::2].set(jnp.cos(position * div_term))
    return pe


def init_params(key):
    """Natural (PyTorch-layout) parameters."""
    ks = jax.random.split(key, 7)

    def w(k, shape, scale=0.05):
        return (scale * jax.random.normal(k, shape)).astype(jnp.float32)

    zeros = lambda s: jnp.zeros(s, jnp.float32)
    ones = lambda s: jnp.ones(s, jnp.float32)
    return dict(
        pe=make_pe(S, D),
        ln1_g=ones((N_LAYERS, D)), ln1_b=zeros((N_LAYERS, D)),
        wq=w(ks[0], (N_LAYERS, D, D)), bq=zeros((N_LAYERS, D)),
        wk=w(ks[1], (N_LAYERS, D, D)), bk=zeros((N_LAYERS, D)),
        wv=w(ks[2], (N_LAYERS, D, D)), bv=zeros((N_LAYERS, D)),
        wo=w(ks[3], (N_LAYERS, D, D)), bo=zeros((N_LAYERS, D)),
        ffn_g=ones((N_LAYERS, D)), ffn_b=zeros((N_LAYERS, D)),
        w1=w(ks[4], (N_LAYERS, D, D_FF)), b1=zeros((N_LAYERS, D_FF)),
        w2=w(ks[5], (N_LAYERS, D_FF, D)), b2=zeros((N_LAYERS, D)),
        fin_g=ones((1, D)), fin_b=zeros((1, D)),
        wout=w(ks[6], (1, D)), bout=zeros((1, 1)),
    )


def pack_params(params, matmul_dtype=jnp.bfloat16):
    """Pack per-matrix params into a few resident kernel slabs.

    Matmul weights go to bf16 (MXU feeds); biases / LN params stay f32 (VPU/EUP work).
    The 1/sqrt(dim_per_head) query scale is folded into wq/bq here (one-time, not per call).
    """
    assert D <= D_FF
    scale = 1.0 / math.sqrt(D // HEADS)
    wq = params["wq"] * scale
    bq = params["bq"] * scale

    wqkv = jnp.concatenate([wq, params["wk"], params["wv"]], axis=-1)          # (L, D, 3D)
    attn_w = jnp.concatenate([wqkv, params["wo"]], axis=-1).astype(matmul_dtype)  # (L, D, 4D)

    w2_pad = jnp.pad(params["w2"], ((0, 0), (0, 0), (0, D_FF - D)))            # (L, D_FF, D_FF)
    ffn_w = jnp.concatenate([params["w1"], w2_pad], axis=1).astype(matmul_dtype)  # (L, D+D_FF, D_FF)

    def padw(v):  # (L, n) -> (L, VECW)
        return jnp.pad(v, ((0, 0), (0, VECW - v.shape[-1])))

    bqkv = jnp.concatenate([bq, params["bk"], params["bv"]], axis=-1)          # (L, 3D)
    vecs = jnp.stack(
        [padw(params["ln1_g"]), padw(params["ln1_b"]), bqkv, padw(params["bo"]),
         padw(params["ffn_g"]), padw(params["ffn_b"]), padw(params["b1"]),
         padw(params["b2"])],
        axis=1).astype(jnp.float32)                                            # (L, 8, 3D)

    bout_row = jnp.zeros((D,), jnp.float32).at[0].set(params["bout"][0, 0])
    head = jnp.concatenate(
        [params["fin_g"], params["fin_b"], params["wout"], bout_row[None, :],
         jnp.zeros((4, D), jnp.float32)], axis=0).astype(jnp.float32)          # (8, D)

    return attn_w, ffn_w, vecs, head


def _pick_doc_block(b, s):
    """Documents per grid step.

    Target enough rows per step to amortize the ~600-cycle step overhead (1024 on
    v5e/v6e, 512 on v7x whose VMEM is 64 MiB), and on v7x guarantee >= 2 steps when
    b >= 2 so the 'parallel' doc axis spans both TensorCores.
    """
    try:
        kind = jax.devices()[0].device_kind.lower()
    except Exception:
        kind = ""
    v7x = "v7" in kind
    target_rows = 512 if v7x else 1024
    db = min(b, max(1, target_rows // s))
    if v7x and b >= 2:
        db = min(db, max(1, b // 2))
    while db > 1 and b % db != 0:
        db -= 1
    return max(db, 1)


def ext_transformer_encoder(top_vecs, mask_bool, params, doc_block=None):
    b, s, d = top_vecs.shape
    maskf = mask_bool.astype(jnp.float32)                     # (b, s), 1 = real sentence
    attn_w, ffn_w, vecs, head = pack_params(params)

    if doc_block is None:
        doc_block = _pick_doc_block(b, s)
    assert b % doc_block == 0
    num_blocks = b // doc_block
    blk_rows = doc_block * s

    mask3 = maskf.reshape(b, 1, s)                            # for input scaling + attn mask
    mask_lane = maskf.reshape(num_blocks, 1, blk_rows)        # lane-major, for the epilogue

    inputs = [top_vecs.astype(jnp.float32), mask3, mask_lane, params["pe"],
              attn_w, ffn_w, vecs, head]

    def resident(a):
        zeros = (0,) * a.ndim
        return pl.BlockSpec(a.shape, lambda i, _z=zeros: _z)  # weights resident every step

    in_specs = [
        pl.BlockSpec((doc_block, s, d), lambda i: (i, 0, 0)),      # activations: doc-tiled
        pl.BlockSpec((doc_block, None, s), lambda i: (i, 0, 0)),   # mask: doc-tiled, dim-1 squeezed
        pl.BlockSpec((1, 1, blk_rows), lambda i: (i, 0, 0)),       # lane-major mask
        resident(params["pe"]),
        resident(attn_w), resident(ffn_w), resident(vecs), resident(head),
    ]

    # Advisory cost estimate so XLA schedules neighbouring ops sensibly.
    rows_total = b * s
    flops = int(rows_total * (N_LAYERS * (8 * d * d + 4 * s * d + 4 * d * D_FF) + 2 * d))
    transcend = int(rows_total * (N_LAYERS * (HEADS * s + D_FF) + 1))
    bytes_accessed = int(sum(a.size * a.dtype.itemsize for a in inputs) + rows_total * 4)

    scores_flat = pl.pallas_call(
        ext_transformer_encoder_kernel,
        out_shape=jax.ShapeDtypeStruct((num_blocks, 1, blk_rows), jnp.float32),
        grid=(num_blocks,),
        in_specs=in_specs,
        out_specs=pl.BlockSpec((1, 1, blk_rows), lambda i: (i, 0, 0)),
        compiler_params=pltpu.CompilerParams(
            dimension_semantics=("parallel",)),     # doc blocks shard across v7x's 2 TCs
        cost_estimate=pl.CostEstimate(flops=flops, transcendentals=transcend,
                                      bytes_accessed=bytes_accessed),
    )(*inputs)
    return scores_flat.reshape(b, s)


if __name__ == "__main__":
    key = jax.random.PRNGKey(0)
    k_x, k_p = jax.random.split(key)
    top_vecs = jax.random.normal(k_x, (B, S, D), dtype=jnp.float32)
    # mask: True = real sentence, False = padding (per-document ragged lengths)
    mask = jnp.array([[1, 1, 1, 1, 1, 1, 0, 0],
                      [1, 1, 1, 1, 0, 0, 0, 0]], dtype=bool)
    params = init_params(k_p)

    sent_scores = ext_transformer_encoder(top_vecs, mask, params)
    jax.block_until_ready(sent_scores)
    assert sent_scores.shape == (B, S)
    assert bool(jnp.all(jnp.isfinite(sent_scores)))
    # TODO(synk): dropout layers are identity (eval mode); training-mode dropout would
    # need pltpu.prng_seed / prng_random_bits.
    print("KERNEL_OK")
</pallas_src>

<mosaic_0001>
module attributes {stable_mosaic.version = 11 : i64} {
  func.func @ext_transformer_encoder_kernel(%arg0: i32, %arg1: memref<2x8x32xf32, #tpu.memory_space<vmem>>, %arg2: memref<2x1x8xf32, #tpu.memory_space<vmem>>, %arg3: memref<1x1x16xf32, #tpu.memory_space<vmem>>, %arg4: memref<8x32xf32, #tpu.memory_space<vmem>>, %arg5: memref<2x32x128xbf16, #tpu.memory_space<vmem>>, %arg6: memref<2x96x64xbf16, #tpu.memory_space<vmem>>, %arg7: memref<2x8x96xf32, #tpu.memory_space<vmem>>, %arg8: memref<8x32xf32, #tpu.memory_space<vmem>>, %arg9: memref<1x1x16xf32, #tpu.memory_space<vmem>>) attributes {dimension_semantics = [#tpu.dimension_semantics<parallel>], iteration_bounds = array<i64: 1>, scalar_prefetch = 0 : i64, scratch_operands = 0 : i64, tpu.core_type = #tpu.core_type<tc>, window_params = [{transform_indices = @transform_0, window_bounds = array<i64: 2, 8, 32>}, {transform_indices = @transform_1, window_bounds = array<i64: 2, 1, 8>}, {transform_indices = @transform_2, window_bounds = array<i64: 1, 1, 16>}, {pipeline_mode = #tpu.pipeline_mode<synchronous>, transform_indices = @transform_3, window_bounds = array<i64: 8, 32>}, {pipeline_mode = #tpu.pipeline_mode<synchronous>, transform_indices = @transform_4, window_bounds = array<i64: 2, 32, 128>}, {pipeline_mode = #tpu.pipeline_mode<synchronous>, transform_indices = @transform_5, window_bounds = array<i64: 2, 96, 64>}, {pipeline_mode = #tpu.pipeline_mode<synchronous>, transform_indices = @transform_6, window_bounds = array<i64: 2, 8, 96>}, {pipeline_mode = #tpu.pipeline_mode<synchronous>, transform_indices = @transform_7, window_bounds = array<i64: 8, 32>}, {transform_indices = @transform_8, window_bounds = array<i64: 1, 1, 16>}]} {
    %c0 = arith.constant 0 : index
    %c0_0 = arith.constant 0 : index
    %c0_1 = arith.constant 0 : index
    %0 = vector.load %arg2[%c0, %c0_0, %c0_1] : memref<2x1x8xf32, #tpu.memory_space<vmem>>, vector<2x1x8xf32>
    %1 = vector.shape_cast %0 : vector<2x1x8xf32> to vector<2x8xf32>
    %c0_2 = arith.constant 0 : index
    %c0_3 = arith.constant 0 : index
    %c0_4 = arith.constant 0 : index
    %2 = vector.load %arg1[%c0_2, %c0_3, %c0_4] : memref<2x8x32xf32, #tpu.memory_space<vmem>>, vector<2x8x32xf32>
    %3 = vector.shape_cast %1 : vector<2x8xf32> to vector<2x8x1xf32>
    %4 = vector.broadcast %3 : vector<2x8x1xf32> to vector<2x8x32xf32>
    %5 = arith.mulf %2, %4 : vector<2x8x32xf32>
    %c0_5 = arith.constant 0 : index
    %c0_6 = arith.constant 0 : index
    %6 = vector.load %arg4[%c0_5, %c0_6] : memref<8x32xf32, #tpu.memory_space<vmem>>, vector<8x32xf32>
    %7 = vector.shape_cast %6 : vector<8x32xf32> to vector<1x8x32xf32>
    %8 = vector.broadcast %7 : vector<1x8x32xf32> to vector<2x8x32xf32>
    %9 = arith.addf %5, %8 : vector<2x8x32xf32>
    %10 = vector.shape_cast %9 : vector<2x8x32xf32> to vector<16x32xf32>
    %cst = arith.constant 1.000000e+00 : f32
    %11 = vector.broadcast %cst : f32 to vector<2x8xf32>
    %12 = arith.subf %1, %11 : vector<2x8xf32>
    %cst_7 = arith.constant 9.99999984E+17 : f32
    %13 = vector.broadcast %cst_7 : f32 to vector<2x8xf32>
    %14 = arith.mulf %12, %13 : vector<2x8xf32>
    %15 = vector.shape_cast %14 : vector<2x8xf32> to vector<2x1x8xf32>
    %c0_8 = arith.constant 0 : index
    %c0_9 = arith.constant 0 : index
    %c0_10 = arith.constant 0 : index
    %16 = vector.load %arg5[%c0_8, %c0_9, %c0_10] : memref<2x32x128xbf16, #tpu.memory_space<vmem>>, vector<1x32x128xbf16>
    %17 = vector.shape_cast %16 : vector<1x32x128xbf16> to vector<32x128xbf16>
    %18 = vector.extract_strided_slice %17 {offsets = [0, 0], sizes = [32, 96], strides = [1, 1]} : vector<32x128xbf16> to vector<32x96xbf16>
    %19 = vector.extract_strided_slice %17 {offsets = [0, 96], sizes = [32, 32], strides = [1, 1]} : vector<32x128xbf16> to vector<32x32xbf16>
    %c0_11 = arith.constant 0 : index
    %c0_12 = arith.constant 0 : index
    %c0_13 = arith.constant 0 : index
    %20 = vector.load %arg6[%c0_11, %c0_12, %c0_13] : memref<2x96x64xbf16, #tpu.memory_space<vmem>>, vector<1x96x64xbf16>
    %21 = vector.shape_cast %20 : vector<1x96x64xbf16> to vector<96x64xbf16>
    %22 = vector.extract_strided_slice %21 {offsets = [0, 0], sizes = [32, 64], strides = [1, 1]} : vector<96x64xbf16> to vector<32x64xbf16>
    %23 = vector.extract_strided_slice %21 {offsets = [32, 0], sizes = [64, 32], strides = [1, 1]} : vector<96x64xbf16> to vector<64x32xbf16>
    %c0_14 = arith.constant 0 : index
    %c0_15 = arith.constant 0 : index
    %c0_16 = arith.constant 0 : index
    %24 = vector.load %arg7[%c0_14, %c0_15, %c0_16] : memref<2x8x96xf32, #tpu.memory_space<vmem>>, vector<1x8x96xf32>
    %25 = vector.shape_cast %24 : vector<1x8x96xf32> to vector<8x96xf32>
    %26 = vector.extract_strided_slice %25 {offsets = [2, 0], sizes = [1, 96], strides = [1, 1]} : vector<8x96xf32> to vector<1x96xf32>
    %27 = vector.extract_strided_slice %25 {offsets = [3, 0], sizes = [1, 32], strides = [1, 1]} : vector<8x96xf32> to vector<1x32xf32>
    %28 = vector.extract_strided_slice %25 {offsets = [4, 0], sizes = [1, 32], strides = [1, 1]} : vector<8x96xf32> to vector<1x32xf32>
    %29 = vector.extract_strided_slice %25 {offsets = [5, 0], sizes = [1, 32], strides = [1, 1]} : vector<8x96xf32> to vector<1x32xf32>
    %30 = vector.extract_strided_slice %25 {offsets = [6, 0], sizes = [1, 64], strides = [1, 1]} : vector<8x96xf32> to vector<1x64xf32>
    %31 = vector.extract_strided_slice %25 {offsets = [7, 0], sizes = [1, 32], strides = [1, 1]} : vector<8x96xf32> to vector<1x32xf32>
    %32 = arith.truncf %10 : vector<16x32xf32> to vector<16x32xbf16>
    %cst_17 = arith.constant dense<0.000000e+00> : vector<16x96xf32>
    %33 = tpu.matmul %32, %18, %cst_17 {dimension_numbers = #tpu.dot_dimension_numbers<[1], [0], [0], [1], [0, 0, 1, 1], [], []>} : vector<16x32xbf16>, vector<32x96xbf16>, vector<16x96xf32> -> vector<16x96xf32>
    %34 = vector.broadcast %26 : vector<1x96xf32> to vector<16x96xf32>
    %35 = arith.addf %33, %34 : vector<16x96xf32>
    %36 = vector.shape_cast %35 : vector<16x96xf32> to vector<2x8x96xf32>
    %37 = vector.extract_strided_slice %36 {offsets = [0, 0, 0], sizes = [2, 8, 8], strides = [1, 1, 1]} : vector<2x8x96xf32> to vector<2x8x8xf32>
    %38 = arith.truncf %37 : vector<2x8x8xf32> to vector<2x8x8xbf16>
    %39 = vector.extract_strided_slice %36 {offsets = [0, 0, 32], sizes = [2, 8, 8], strides = [1, 1, 1]} : vector<2x8x96xf32> to vector<2x8x8xf32>
    %40 = arith.truncf %39 : vector<2x8x8xf32> to vector<2x8x8xbf16>
    %41 = vector.extract_strided_slice %36 {offsets = [0, 0, 64], sizes = [2, 8, 8], strides = [1, 1, 1]} : vector<2x8x96xf32> to vector<2x8x8xf32>
    %42 = arith.truncf %41 : vector<2x8x8xf32> to vector<2x8x8xbf16>
    "tpu.trace_start"() <{level = 10 : i32, message = "bqd,bkd->bqk"}> : () -> ()
    %cst_18 = arith.constant dense<0.000000e+00> : vector<2x8x8xf32>
    %43 = tpu.matmul %38, %40, %cst_18 {dimension_numbers = #tpu.dot_dimension_numbers<[2], [2], [1], [1], [0, 0, 0, 1, 1, 1], [0], [0]>} : vector<2x8x8xbf16>, vector<2x8x8xbf16>, vector<2x8x8xf32> -> vector<2x8x8xf32>
    "tpu.trace_stop"() : () -> ()
    %44 = vector.broadcast %15 : vector<2x1x8xf32> to vector<2x8x8xf32>
    %45 = arith.addf %43, %44 : vector<2x8x8xf32>
    %cst_19 = arith.constant dense<0xFF800000> : vector<2x8xf32>
    %46 = vector.multi_reduction <maximumf>, %45, %cst_19 [2] : vector<2x8x8xf32> to vector<2x8xf32>
    %47 = vector.shape_cast %46 : vector<2x8xf32> to vector<2x8x1xf32>
    %48 = vector.broadcast %47 : vector<2x8x1xf32> to vector<2x8x8xf32>
    %49 = arith.subf %45, %48 : vector<2x8x8xf32>
    %50 = math.exp %49 : vector<2x8x8xf32>
    %cst_20 = arith.constant dense<0.000000e+00> : vector<2x8xf32>
    %51 = vector.multi_reduction <add>, %50, %cst_20 [2] : vector<2x8x8xf32> to vector<2x8xf32>
    %52 = vector.shape_cast %51 : vector<2x8xf32> to vector<2x8x1xf32>
    %53 = tpu.reciprocal %52 {approx = true} : vector<2x8x1xf32> -> vector<2x8x1xf32>
    %54 = vector.broadcast %53 : vector<2x8x1xf32> to vector<2x8x8xf32>
    %55 = arith.mulf %50, %54 : vector<2x8x8xf32>
    %56 = arith.truncf %55 : vector<2x8x8xf32> to vector<2x8x8xbf16>
    "tpu.trace_start"() <{level = 10 : i32, message = "bqk,bkd->bqd"}> : () -> ()
    %cst_21 = arith.constant dense<0.000000e+00> : vector<2x8x8xf32>
    %57 = tpu.matmul %56, %42, %cst_21 {dimension_numbers = #tpu.dot_dimension_numbers<[2], [1], [1], [2], [0, 0, 0, 1, 1, 2], [0], [0]>} : vector<2x8x8xbf16>, vector<2x8x8xbf16>, vector<2x8x8xf32> -> vector<2x8x8xf32>
    "tpu.trace_stop"() : () -> ()
    %58 = vector.extract_strided_slice %36 {offsets = [0, 0, 8], sizes = [2, 8, 8], strides = [1, 1, 1]} : vector<2x8x96xf32> to vector<2x8x8xf32>
    %59 = arith.truncf %58 : vector<2x8x8xf32> to vector<2x8x8xbf16>
    %60 = vector.extract_strided_slice %36 {offsets = [0, 0, 40], sizes = [2, 8, 8], strides = [1, 1, 1]} : vector<2x8x96xf32> to vector<2x8x8xf32>
    %61 = arith.truncf %60 : vector<2x8x8xf32> to vector<2x8x8xbf16>
    %62 = vector.extract_strided_slice %36 {offsets = [0, 0, 72], sizes = [2, 8, 8], strides = [1, 1, 1]} : vector<2x8x96xf32> to vector<2x8x8xf32>
    %63 = arith.truncf %62 : vector<2x8x8xf32> to vector<2x8x8xbf16>
    "tpu.trace_start"() <{level = 10 : i32, message = "bqd,bkd->bqk"}> : () -> ()
    %cst_22 = arith.constant dense<0.000000e+00> : vector<2x8x8xf32>
    %64 = tpu.matmul %59, %61, %cst_22 {dimension_numbers = #tpu.dot_dimension_numbers<[2], [2], [1], [1], [0, 0, 0, 1, 1, 1], [0], [0]>} : vector<2x8x8xbf16>, vector<2x8x8xbf16>, vector<2x8x8xf32> -> vector<2x8x8xf32>
    "tpu.trace_stop"() : () -> ()
    %65 = vector.broadcast %15 : vector<2x1x8xf32> to vector<2x8x8xf32>
    %66 = arith.addf %64, %65 : vector<2x8x8xf32>
    %cst_23 = arith.constant dense<0xFF800000> : vector<2x8xf32>
    %67 = vector.multi_reduction <maximumf>, %66, %cst_23 [2] : vector<2x8x8xf32> to vector<2x8xf32>
    %68 = vector.shape_cast %67 : vector<2x8xf32> to vector<2x8x1xf32>
    %69 = vector.broadcast %68 : vector<2x8x1xf32> to vector<2x8x8xf32>
    %70 = arith.subf %66, %69 : vector<2x8x8xf32>
    %71 = math.exp %70 : vector<2x8x8xf32>
    %cst_24 = arith.constant dense<0.000000e+00> : vector<2x8xf32>
    %72 = vector.multi_reduction <add>, %71, %cst_24 [2] : vector<2x8x8xf32> to vector<2x8xf32>
    %73 = vector.shape_cast %72 : vector<2x8xf32> to vector<2x8x1xf32>
    %74 = tpu.reciprocal %73 {approx = true} : vector<2x8x1xf32> -> vector<2x8x1xf32>
    %75 = vector.broadcast %74 : vector<2x8x1xf32> to vector<2x8x8xf32>
    %76 = arith.mulf %71, %75 : vector<2x8x8xf32>
    %77 = arith.truncf %76 : vector<2x8x8xf32> to vector<2x8x8xbf16>
    "tpu.trace_start"() <{level = 10 : i32, message = "bqk,bkd->bqd"}> : () -> ()
    %cst_25 = arith.constant dense<0.000000e+00> : vector<2x8x8xf32>
    %78 = tpu.matmul %77, %63, %cst_25 {dimension_numbers = #tpu.dot_dimension_numbers<[2], [1], [1], [2], [0, 0, 0, 1, 1, 2], [0], [0]>} : vector<2x8x8xbf16>, vector<2x8x8xbf16>, vector<2x8x8xf32> -> vector<2x8x8xf32>
    "tpu.trace_stop"() : () -> ()
    %79 = vector.extract_strided_slice %36 {offsets = [0, 0, 16], sizes = [2, 8, 8], strides = [1, 1, 1]} : vector<2x8x96xf32> to vector<2x8x8xf32>
    %80 = arith.truncf %79 : vector<2x8x8xf32> to vector<2x8x8xbf16>
    %81 = vector.extract_strided_slice %36 {offsets = [0, 0, 48], sizes = [2, 8, 8], strides = [1, 1, 1]} : vector<2x8x96xf32> to vector<2x8x8xf32>
    %82 = arith.truncf %81 : vector<2x8x8xf32> to vector<2x8x8xbf16>
    %83 = vector.extract_strided_slice %36 {offsets = [0, 0, 80], sizes = [2, 8, 8], strides = [1, 1, 1]} : vector<2x8x96xf32> to vector<2x8x8xf32>
    %84 = arith.truncf %83 : vector<2x8x8xf32> to vector<2x8x8xbf16>
    "tpu.trace_start"() <{level = 10 : i32, message = "bqd,bkd->bqk"}> : () -> ()
    %cst_26 = arith.constant dense<0.000000e+00> : vector<2x8x8xf32>
    %85 = tpu.matmul %80, %82, %cst_26 {dimension_numbers = #tpu.dot_dimension_numbers<[2], [2], [1], [1], [0, 0, 0, 1, 1, 1], [0], [0]>} : vector<2x8x8xbf16>, vector<2x8x8xbf16>, vector<2x8x8xf32> -> vector<2x8x8xf32>
    "tpu.trace_stop"() : () -> ()
    %86 = vector.broadcast %15 : vector<2x1x8xf32> to vector<2x8x8xf32>
    %87 = arith.addf %85, %86 : vector<2x8x8xf32>
    %cst_27 = arith.constant dense<0xFF800000> : vector<2x8xf32>
    %88 = vector.multi_reduction <maximumf>, %87, %cst_27 [2] : vector<2x8x8xf32> to vector<2x8xf32>
    %89 = vector.shape_cast %88 : vector<2x8xf32> to vector<2x8x1xf32>
    %90 = vector.broadcast %89 : vector<2x8x1xf32> to vector<2x8x8xf32>
    %91 = arith.subf %87, %90 : vector<2x8x8xf32>
    %92 = math.exp %91 : vector<2x8x8xf32>
    %cst_28 = arith.constant dense<0.000000e+00> : vector<2x8xf32>
    %93 = vector.multi_reduction <add>, %92, %cst_28 [2] : vector<2x8x8xf32> to vector<2x8xf32>
    %94 = vector.shape_cast %93 : vector<2x8xf32> to vector<2x8x1xf32>
    %95 = tpu.reciprocal %94 {approx = true} : vector<2x8x1xf32> -> vector<2x8x1xf32>
    %96 = vector.broadcast %95 : vector<2x8x1xf32> to vector<2x8x8xf32>
    %97 = arith.mulf %92, %96 : vector<2x8x8xf32>
    %98 = arith.truncf %97 : vector<2x8x8xf32> to vector<2x8x8xbf16>
    "tpu.trace_start"() <{level = 10 : i32, message = "bqk,bkd->bqd"}> : () -> ()
    %cst_29 = arith.constant dense<0.000000e+00> : vector<2x8x8xf32>
    %99 = tpu.matmul %98, %84, %cst_29 {dimension_numbers = #tpu.dot_dimension_numbers<[2], [1], [1], [2], [0, 0, 0, 1, 1, 2], [0], [0]>} : vector<2x8x8xbf16>, vector<2x8x8xbf16>, vector<2x8x8xf32> -> vector<2x8x8xf32>
    "tpu.trace_stop"() : () -> ()
    %100 = vector.extract_strided_slice %36 {offsets = [0, 0, 24], sizes = [2, 8, 8], strides = [1, 1, 1]} : vector<2x8x96xf32> to vector<2x8x8xf32>
    %101 = arith.truncf %100 : vector<2x8x8xf32> to vector<2x8x8xbf16>
    %102 = vector.extract_strided_slice %36 {offsets = [0, 0, 56], sizes = [2, 8, 8], strides = [1, 1, 1]} : vector<2x8x96xf32> to vector<2x8x8xf32>
    %103 = arith.truncf %102 : vector<2x8x8xf32> to vector<2x8x8xbf16>
    %104 = vector.extract_strided_slice %36 {offsets = [0, 0, 88], sizes = [2, 8, 8], strides = [1, 1, 1]} : vector<2x8x96xf32> to vector<2x8x8xf32>
    %105 = arith.truncf %104 : vector<2x8x8xf32> to vector<2x8x8xbf16>
    "tpu.trace_start"() <{level = 10 : i32, message = "bqd,bkd->bqk"}> : () -> ()
    %cst_30 = arith.constant dense<0.000000e+00> : vector<2x8x8xf32>
    %106 = tpu.matmul %101, %103, %cst_30 {dimension_numbers = #tpu.dot_dimension_numbers<[2], [2], [1], [1], [0, 0, 0, 1, 1, 1], [0], [0]>} : vector<2x8x8xbf16>, vector<2x8x8xbf16>, vector<2x8x8xf32> -> vector<2x8x8xf32>
    "tpu.trace_stop"() : () -> ()
    %107 = vector.broadcast %15 : vector<2x1x8xf32> to vector<2x8x8xf32>
    %108 = arith.addf %106, %107 : vector<2x8x8xf32>
    %cst_31 = arith.constant dense<0xFF800000> : vector<2x8xf32>
    %109 = vector.multi_reduction <maximumf>, %108, %cst_31 [2] : vector<2x8x8xf32> to vector<2x8xf32>
    %110 = vector.shape_cast %109 : vector<2x8xf32> to vector<2x8x1xf32>
    %111 = vector.broadcast %110 : vector<2x8x1xf32> to vector<2x8x8xf32>
    %112 = arith.subf %108, %111 : vector<2x8x8xf32>
    %113 = math.exp %112 : vector<2x8x8xf32>
    %cst_32 = arith.constant dense<0.000000e+00> : vector<2x8xf32>
    %114 = vector.multi_reduction <add>, %113, %cst_32 [2] : vector<2x8x8xf32> to vector<2x8xf32>
    %115 = vector.shape_cast %114 : vector<2x8xf32> to vector<2x8x1xf32>
    %116 = tpu.reciprocal %115 {approx = true} : vector<2x8x1xf32> -> vector<2x8x1xf32>
    %117 = vector.broadcast %116 : vector<2x8x1xf32> to vector<2x8x8xf32>
    %118 = arith.mulf %113, %117 : vector<2x8x8xf32>
    %119 = arith.truncf %118 : vector<2x8x8xf32> to vector<2x8x8xbf16>
    "tpu.trace_start"() <{level = 10 : i32, message = "bqk,bkd->bqd"}> : () -> ()
    %cst_33 = arith.constant dense<0.000000e+00> : vector<2x8x8xf32>
    %120 = tpu.matmul %119, %105, %cst_33 {dimension_numbers = #tpu.dot_dimension_numbers<[2], [1], [1], [2], [0, 0, 0, 1, 1, 2], [0], [0]>} : vector<2x8x8xbf16>, vector<2x8x8xbf16>, vector<2x8x8xf32> -> vector<2x8x8xf32>
    "tpu.trace_stop"() : () -> ()
    %121 = tpu.concatenate %57, %78, %99, %120 in 2 : vector<2x8x8xf32>, vector<2x8x8xf32>, vector<2x8x8xf32>, vector<2x8x8xf32> -> vector<2x8x32xf32>
    %122 = vector.shape_cast %121 : vector<2x8x32xf32> to vector<16x32xf32>
    %123 = arith.truncf %122 : vector<16x32xf32> to vector<16x32xbf16>
    %cst_34 = arith.constant dense<0.000000e+00> : vector<16x32xf32>
    %124 = tpu.matmul %123, %19, %cst_34 {dimension_numbers = #tpu.dot_dimension_numbers<[1], [0], [0], [1], [0, 0, 1, 1], [], []>} : vector<16x32xbf16>, vector<32x32xbf16>, vector<16x32xf32> -> vector<16x32xf32>
    %125 = vector.broadcast %27 : vector<1x32xf32> to vector<16x32xf32>
    %126 = arith.addf %124, %125 : vector<16x32xf32>
    %127 = arith.addf %126, %10 : vector<16x32xf32>
    %cst_35 = arith.constant dense<0.000000e+00> : vector<16xf32>
    %128 = vector.multi_reduction <add>, %127, %cst_35 [1] : vector<16x32xf32> to vector<16xf32>
    %129 = vector.shape_cast %128 : vector<16xf32> to vector<16x1xf32>
    %cst_36 = arith.constant 3.200000e+01 : f32
    %130 = vector.broadcast %cst_36 : f32 to vector<16x1xf32>
    %131 = arith.divf %129, %130 : vector<16x1xf32>
    %132 = vector.broadcast %131 : vector<16x1xf32> to vector<16x32xf32>
    %133 = arith.subf %127, %132 : vector<16x32xf32>
    %134 = arith.mulf %133, %133 : vector<16x32xf32>
    %cst_37 = arith.constant dense<0.000000e+00> : vector<16xf32>
    %135 = vector.multi_reduction <add>, %134, %cst_37 [1] : vector<16x32xf32> to vector<16xf32>
    %136 = vector.shape_cast %135 : vector<16xf32> to vector<16x1xf32>
    %cst_38 = arith.constant 3.200000e+01 : f32
    %137 = vector.broadcast %cst_38 : f32 to vector<16x1xf32>
    %138 = arith.divf %136, %137 : vector<16x1xf32>
    %139 = vector.broadcast %131 : vector<16x1xf32> to vector<16x32xf32>
    %140 = arith.subf %127, %139 : vector<16x32xf32>
    %cst_39 = arith.constant 9.99999997E-7 : f32
    %141 = vector.broadcast %cst_39 : f32 to vector<16x1xf32>
    %142 = arith.addf %138, %141 : vector<16x1xf32>
    %143 = math.rsqrt %142 : vector<16x1xf32>
    %144 = vector.broadcast %143 : vector<16x1xf32> to vector<16x32xf32>
    %145 = arith.mulf %140, %144 : vector<16x32xf32>
    %146 = vector.broadcast %28 : vector<1x32xf32> to vector<16x32xf32>
    %147 = arith.mulf %145, %146 : vector<16x32xf32>
    %148 = vector.broadcast %29 : vector<1x32xf32> to vector<16x32xf32>
    %149 = arith.addf %147, %148 : vector<16x32xf32>
    %150 = arith.truncf %149 : vector<16x32xf32> to vector<16x32xbf16>
    %cst_40 = arith.constant dense<0.000000e+00> : vector<16x64xf32>
    %151 = tpu.matmul %150, %22, %cst_40 {dimension_numbers = #tpu.dot_dimension_numbers<[1], [0], [0], [1], [0, 0, 1, 1], [], []>} : vector<16x32xbf16>, vector<32x64xbf16>, vector<16x64xf32> -> vector<16x64xf32>
    %152 = vector.broadcast %30 : vector<1x64xf32> to vector<16x64xf32>
    %153 = arith.addf %151, %152 : vector<16x64xf32>
    %cst_41 = arith.constant 5.000000e-01 : f32
    %154 = vector.broadcast %cst_41 : f32 to vector<16x64xf32>
    %155 = arith.mulf %154, %153 : vector<16x64xf32>
    %156 = arith.mulf %153, %153 : vector<16x64xf32>
    %157 = arith.mulf %153, %156 : vector<16x64xf32>
    %cst_42 = arith.constant 4.471500e-02 : f32
    %158 = vector.broadcast %cst_42 : f32 to vector<16x64xf32>
    %159 = arith.mulf %158, %157 : vector<16x64xf32>
    %160 = arith.addf %153, %159 : vector<16x64xf32>
    %cst_43 = arith.constant 0.797884583 : f32
    %161 = vector.broadcast %cst_43 : f32 to vector<16x64xf32>
    %162 = arith.mulf %161, %160 : vector<16x64xf32>
    %163 = math.tanh %162 : vector<16x64xf32>
    %cst_44 = arith.constant 1.000000e+00 : f32
    %164 = vector.broadcast %cst_44 : f32 to vector<16x64xf32>
    %165 = arith.addf %164, %163 : vector<16x64xf32>
    %166 = arith.mulf %155, %165 : vector<16x64xf32>
    %167 = arith.truncf %166 : vector<16x64xf32> to vector<16x64xbf16>
    %cst_45 = arith.constant dense<0.000000e+00> : vector<16x32xf32>
    %168 = tpu.matmul %167, %23, %cst_45 {dimension_numbers = #tpu.dot_dimension_numbers<[1], [0], [0], [1], [0, 0, 1, 1], [], []>} : vector<16x64xbf16>, vector<64x32xbf16>, vector<16x32xf32> -> vector<16x32xf32>
    %169 = vector.broadcast %31 : vector<1x32xf32> to vector<16x32xf32>
    %170 = arith.addf %168, %169 : vector<16x32xf32>
    %171 = arith.addf %170, %127 : vector<16x32xf32>
    %c1 = arith.constant 1 : index
    %c0_46 = arith.constant 0 : index
    %c0_47 = arith.constant 0 : index
    %172 = vector.load %arg5[%c1, %c0_46, %c0_47] : memref<2x32x128xbf16, #tpu.memory_space<vmem>>, vector<1x32x128xbf16>
    %173 = vector.shape_cast %172 : vector<1x32x128xbf16> to vector<32x128xbf16>
    %174 = vector.extract_strided_slice %173 {offsets = [0, 0], sizes = [32, 96], strides = [1, 1]} : vector<32x128xbf16> to vector<32x96xbf16>
    %175 = vector.extract_strided_slice %173 {offsets = [0, 96], sizes = [32, 32], strides = [1, 1]} : vector<32x128xbf16> to vector<32x32xbf16>
    %c1_48 = arith.constant 1 : index
    %c0_49 = arith.constant 0 : index
    %c0_50 = arith.constant 0 : index
    %176 = vector.load %arg6[%c1_48, %c0_49, %c0_50] : memref<2x96x64xbf16, #tpu.memory_space<vmem>>, vector<1x96x64xbf16>
    %177 = vector.shape_cast %176 : vector<1x96x64xbf16> to vector<96x64xbf16>
    %178 = vector.extract_strided_slice %177 {offsets = [0, 0], sizes = [32, 64], strides = [1, 1]} : vector<96x64xbf16> to vector<32x64xbf16>
    %179 = vector.extract_strided_slice %177 {offsets = [32, 0], sizes = [64, 32], strides = [1, 1]} : vector<96x64xbf16> to vector<64x32xbf16>
    %c1_51 = arith.constant 1 : index
    %c0_52 = arith.constant 0 : index
    %c0_53 = arith.constant 0 : index
    %180 = vector.load %arg7[%c1_51, %c0_52, %c0_53] : memref<2x8x96xf32, #tpu.memory_space<vmem>>, vector<1x8x96xf32>
    %181 = vector.shape_cast %180 : vector<1x8x96xf32> to vector<8x96xf32>
    %182 = vector.extract_strided_slice %181 {offsets = [0, 0], sizes = [1, 32], strides = [1, 1]} : vector<8x96xf32> to vector<1x32xf32>
    %183 = vector.extract_strided_slice %181 {offsets = [1, 0], sizes = [1, 32], strides = [1, 1]} : vector<8x96xf32> to vector<1x32xf32>
    %184 = vector.extract_strided_slice %181 {offsets = [2, 0], sizes = [1, 96], strides = [1, 1]} : vector<8x96xf32> to vector<1x96xf32>
    %185 = vector.extract_strided_slice %181 {offsets = [3, 0], sizes = [1, 32], strides = [1, 1]} : vector<8x96xf32> to vector<1x32xf32>
    %186 = vector.extract_strided_slice %181 {offsets = [4, 0], sizes = [1, 32], strides = [1, 1]} : vector<8x96xf32> to vector<1x32xf32>
    %187 = vector.extract_strided_slice %181 {offsets = [5, 0], sizes = [1, 32], strides = [1, 1]} : vector<8x96xf32> to vector<1x32xf32>
    %188 = vector.extract_strided_slice %181 {offsets = [6, 0], sizes = [1, 64], strides = [1, 1]} : vector<8x96xf32> to vector<1x64xf32>
    %189 = vector.extract_strided_slice %181 {offsets = [7, 0], sizes = [1, 32], strides = [1, 1]} : vector<8x96xf32> to vector<1x32xf32>
    %cst_54 = arith.constant dense<0.000000e+00> : vector<16xf32>
    %190 = vector.multi_reduction <add>, %171, %cst_54 [1] : vector<16x32xf32> to vector<16xf32>
    %191 = vector.shape_cast %190 : vector<16xf32> to vector<16x1xf32>
    %cst_55 = arith.constant 3.200000e+01 : f32
    %192 = vector.broadcast %cst_55 : f32 to vector<16x1xf32>
    %193 = arith.divf %191, %192 : vector<16x1xf32>
    %194 = vector.broadcast %193 : vector<16x1xf32> to vector<16x32xf32>
    %195 = arith.subf %171, %194 : vector<16x32xf32>
    %196 = arith.mulf %195, %195 : vector<16x32xf32>
    %cst_56 = arith.constant dense<0.000000e+00> : vector<16xf32>
    %197 = vector.multi_reduction <add>, %196, %cst_56 [1] : vector<16x32xf32> to vector<16xf32>
    %198 = vector.shape_cast %197 : vector<16xf32> to vector<16x1xf32>
    %cst_57 = arith.constant 3.200000e+01 : f32
    %199 = vector.broadcast %cst_57 : f32 to vector<16x1xf32>
    %200 = arith.divf %198, %199 : vector<16x1xf32>
    %201 = vector.broadcast %193 : vector<16x1xf32> to vector<16x32xf32>
    %202 = arith.subf %171, %201 : vector<16x32xf32>
    %cst_58 = arith.constant 9.99999997E-7 : f32
    %203 = vector.broadcast %cst_58 : f32 to vector<16x1xf32>
    %204 = arith.addf %200, %203 : vector<16x1xf32>
    %205 = math.rsqrt %204 : vector<16x1xf32>
    %206 = vector.broadcast %205 : vector<16x1xf32> to vector<16x32xf32>
    %207 = arith.mulf %202, %206 : vector<16x32xf32>
    %208 = vector.broadcast %182 : vector<1x32xf32> to vector<16x32xf32>
    %209 = arith.mulf %207, %208 : vector<16x32xf32>
    %210 = vector.broadcast %183 : vector<1x32xf32> to vector<16x32xf32>
    %211 = arith.addf %209, %210 : vector<16x32xf32>
    %212 = arith.truncf %211 : vector<16x32xf32> to vector<16x32xbf16>
    %cst_59 = arith.constant dense<0.000000e+00> : vector<16x96xf32>
    %213 = tpu.matmul %212, %174, %cst_59 {dimension_numbers = #tpu.dot_dimension_numbers<[1], [0], [0], [1], [0, 0, 1, 1], [], []>} : vector<16x32xbf16>, vector<32x96xbf16>, vector<16x96xf32> -> vector<16x96xf32>
    %214 = vector.broadcast %184 : vector<1x96xf32> to vector<16x96xf32>
    %215 = arith.addf %213, %214 : vector<16x96xf32>
    %216 = vector.shape_cast %215 : vector<16x96xf32> to vector<2x8x96xf32>
    %217 = vector.extract_strided_slice %216 {offsets = [0, 0, 0], sizes = [2, 8, 8], strides = [1, 1, 1]} : vector<2x8x96xf32> to vector<2x8x8xf32>
    %218 = arith.truncf %217 : vector<2x8x8xf32> to vector<2x8x8xbf16>
    %219 = vector.extract_strided_slice %216 {offsets = [0, 0, 32], sizes = [2, 8, 8], strides = [1, 1, 1]} : vector<2x8x96xf32> to vector<2x8x8xf32>
    %220 = arith.truncf %219 : vector<2x8x8xf32> to vector<2x8x8xbf16>
    %221 = vector.extract_strided_slice %216 {offsets = [0, 0, 64], sizes = [2, 8, 8], strides = [1, 1, 1]} : vector<2x8x96xf32> to vector<2x8x8xf32>
    %222 = arith.truncf %221 : vector<2x8x8xf32> to vector<2x8x8xbf16>
    "tpu.trace_start"() <{level = 10 : i32, message = "bqd,bkd->bqk"}> : () -> ()
    %cst_60 = arith.constant dense<0.000000e+00> : vector<2x8x8xf32>
    %223 = tpu.matmul %218, %220, %cst_60 {dimension_numbers = #tpu.dot_dimension_numbers<[2], [2], [1], [1], [0, 0, 0, 1, 1, 1], [0], [0]>} : vector<2x8x8xbf16>, vector<2x8x8xbf16>, vector<2x8x8xf32> -> vector<2x8x8xf32>
    "tpu.trace_stop"() : () -> ()
    %224 = vector.broadcast %15 : vector<2x1x8xf32> to vector<2x8x8xf32>
    %225 = arith.addf %223, %224 : vector<2x8x8xf32>
    %cst_61 = arith.constant dense<0xFF800000> : vector<2x8xf32>
    %226 = vector.multi_reduction <maximumf>, %225, %cst_61 [2] : vector<2x8x8xf32> to vector<2x8xf32>
    %227 = vector.shape_cast %226 : vector<2x8xf32> to vector<2x8x1xf32>
    %228 = vector.broadcast %227 : vector<2x8x1xf32> to vector<2x8x8xf32>
    %229 = arith.subf %225, %228 : vector<2x8x8xf32>
    %230 = math.exp %229 : vector<2x8x8xf32>
    %cst_62 = arith.constant dense<0.000000e+00> : vector<2x8xf32>
    %231 = vector.multi_reduction <add>, %230, %cst_62 [2] : vector<2x8x8xf32> to vector<2x8xf32>
    %232 = vector.shape_cast %231 : vector<2x8xf32> to vector<2x8x1xf32>
    %233 = tpu.reciprocal %232 {approx = true} : vector<2x8x1xf32> -> vector<2x8x1xf32>
    %234 = vector.broadcast %233 : vector<2x8x1xf32> to vector<2x8x8xf32>
    %235 = arith.mulf %230, %234 : vector<2x8x8xf32>
    %236 = arith.truncf %235 : vector<2x8x8xf32> to vector<2x8x8xbf16>
    "tpu.trace_start"() <{level = 10 : i32, message = "bqk,bkd->bqd"}> : () -> ()
    %cst_63 = arith.constant dense<0.000000e+00> : vector<2x8x8xf32>
    %237 = tpu.matmul %236, %222, %cst_63 {dimension_numbers = #tpu.dot_dimension_numbers<[2], [1], [1], [2], [0, 0, 0, 1, 1, 2], [0], [0]>} : vector<2x8x8xbf16>, vector<2x8x8xbf16>, vector<2x8x8xf32> -> vector<2x8x8xf32>
    "tpu.trace_stop"() : () -> ()
    %238 = vector.extract_strided_slice %216 {offsets = [0, 0, 8], sizes = [2, 8, 8], strides = [1, 1, 1]} : vector<2x8x96xf32> to vector<2x8x8xf32>
    %239 = arith.truncf %238 : vector<2x8x8xf32> to vector<2x8x8xbf16>
    %240 = vector.extract_strided_slice %216 {offsets = [0, 0, 40], sizes = [2, 8, 8], strides = [1, 1, 1]} : vector<2x8x96xf32> to vector<2x8x8xf32>
    %241 = arith.truncf %240 : vector<2x8x8xf32> to vector<2x8x8xbf16>
    %242 = vector.extract_strided_slice %216 {offsets = [0, 0, 72], sizes = [2, 8, 8], strides = [1, 1, 1]} : vector<2x8x96xf32> to vector<2x8x8xf32>
    %243 = arith.truncf %242 : vector<2x8x8xf32> to vector<2x8x8xbf16>
    "tpu.trace_start"() <{level = 10 : i32, message = "bqd,bkd->bqk"}> : () -> ()
    %cst_64 = arith.constant dense<0.000000e+00> : vector<2x8x8xf32>
    %244 = tpu.matmul %239, %241, %cst_64 {dimension_numbers = #tpu.dot_dimension_numbers<[2], [2], [1], [1], [0, 0, 0, 1, 1, 1], [0], [0]>} : vector<2x8x8xbf16>, vector<2x8x8xbf16>, vector<2x8x8xf32> -> vector<2x8x8xf32>
    "tpu.trace_stop"() : () -> ()
    %245 = vector.broadcast %15 : vector<2x1x8xf32> to vector<2x8x8xf32>
    %246 = arith.addf %244, %245 : vector<2x8x8xf32>
    %cst_65 = arith.constant dense<0xFF800000> : vector<2x8xf32>
    %247 = vector.multi_reduction <maximumf>, %246, %cst_65 [2] : vector<2x8x8xf32> to vector<2x8xf32>
    %248 = vector.shape_cast %247 : vector<2x8xf32> to vector<2x8x1xf32>
    %249 = vector.broadcast %248 : vector<2x8x1xf32> to vector<2x8x8xf32>
    %250 = arith.subf %246, %249 : vector<2x8x8xf32>
    %251 = math.exp %250 : vector<2x8x8xf32>
    %cst_66 = arith.constant dense<0.000000e+00> : vector<2x8xf32>
    %252 = vector.multi_reduction <add>, %251, %cst_66 [2] : vector<2x8x8xf32> to vector<2x8xf32>
    %253 = vector.shape_cast %252 : vector<2x8xf32> to vector<2x8x1xf32>
    %254 = tpu.reciprocal %253 {approx = true} : vector<2x8x1xf32> -> vector<2x8x1xf32>
    %255 = vector.broadcast %254 : vector<2x8x1xf32> to vector<2x8x8xf32>
    %256 = arith.mulf %251, %255 : vector<2x8x8xf32>
    %257 = arith.truncf %256 : vector<2x8x8xf32> to vector<2x8x8xbf16>
    "tpu.trace_start"() <{level = 10 : i32, message = "bqk,bkd->bqd"}> : () -> ()
    %cst_67 = arith.constant dense<0.000000e+00> : vector<2x8x8xf32>
    %258 = tpu.matmul %257, %243, %cst_67 {dimension_numbers = #tpu.dot_dimension_numbers<[2], [1], [1], [2], [0, 0, 0, 1, 1, 2], [0], [0]>} : vector<2x8x8xbf16>, vector<2x8x8xbf16>, vector<2x8x8xf32> -> vector<2x8x8xf32>
    "tpu.trace_stop"() : () -> ()
    %259 = vector.extract_strided_slice %216 {offsets = [0, 0, 16], sizes = [2, 8, 8], strides = [1, 1, 1]} : vector<2x8x96xf32> to vector<2x8x8xf32>
    %260 = arith.truncf %259 : vector<2x8x8xf32> to vector<2x8x8xbf16>
    %261 = vector.extract_strided_slice %216 {offsets = [0, 0, 48], sizes = [2, 8, 8], strides = [1, 1, 1]} : vector<2x8x96xf32> to vector<2x8x8xf32>
    %262 = arith.truncf %261 : vector<2x8x8xf32> to vector<2x8x8xbf16>
    %263 = vector.extract_strided_slice %216 {offsets = [0, 0, 80], sizes = [2, 8, 8], strides = [1, 1, 1]} : vector<2x8x96xf32> to vector<2x8x8xf32>
    %264 = arith.truncf %263 : vector<2x8x8xf32> to vector<2x8x8xbf16>
    "tpu.trace_start"() <{level = 10 : i32, message = "bqd,bkd->bqk"}> : () -> ()
    %cst_68 = arith.constant dense<0.000000e+00> : vector<2x8x8xf32>
    %265 = tpu.matmul %260, %262, %cst_68 {dimension_numbers = #tpu.dot_dimension_numbers<[2], [2], [1], [1], [0, 0, 0, 1, 1, 1], [0], [0]>} : vector<2x8x8xbf16>, vector<2x8x8xbf16>, vector<2x8x8xf32> -> vector<2x8x8xf32>
    "tpu.trace_stop"() : () -> ()
    %266 = vector.broadcast %15 : vector<2x1x8xf32> to vector<2x8x8xf32>
    %267 = arith.addf %265, %266 : vector<2x8x8xf32>
    %cst_69 = arith.constant dense<0xFF800000> : vector<2x8xf32>
    %268 = vector.multi_reduction <maximumf>, %267, %cst_69 [2] : vector<2x8x8xf32> to vector<2x8xf32>
    %269 = vector.shape_cast %268 : vector<2x8xf32> to vector<2x8x1xf32>
    %270 = vector.broadcast %269 : vector<2x8x1xf32> to vector<2x8x8xf32>
    %271 = arith.subf %267, %270 : vector<2x8x8xf32>
    %272 = math.exp %271 : vector<2x8x8xf32>
    %cst_70 = arith.constant dense<0.000000e+00> : vector<2x8xf32>
    %273 = vector.multi_reduction <add>, %272, %cst_70 [2] : vector<2x8x8xf32> to vector<2x8xf32>
    %274 = vector.shape_cast %273 : vector<2x8xf32> to vector<2x8x1xf32>
    %275 = tpu.reciprocal %274 {approx = true} : vector<2x8x1xf32> -> vector<2x8x1xf32>
    %276 = vector.broadcast %275 : vector<2x8x1xf32> to vector<2x8x8xf32>
    %277 = arith.mulf %272, %276 : vector<2x8x8xf32>
    %278 = arith.truncf %277 : vector<2x8x8xf32> to vector<2x8x8xbf16>
    "tpu.trace_start"() <{level = 10 : i32, message = "bqk,bkd->bqd"}> : () -> ()
    %cst_71 = arith.constant dense<0.000000e+00> : vector<2x8x8xf32>
    %279 = tpu.matmul %278, %264, %cst_71 {dimension_numbers = #tpu.dot_dimension_numbers<[2], [1], [1], [2], [0, 0, 0, 1, 1, 2], [0], [0]>} : vector<2x8x8xbf16>, vector<2x8x8xbf16>, vector<2x8x8xf32> -> vector<2x8x8xf32>
    "tpu.trace_stop"() : () -> ()
    %280 = vector.extract_strided_slice %216 {offsets = [0, 0, 24], sizes = [2, 8, 8], strides = [1, 1, 1]} : vector<2x8x96xf32> to vector<2x8x8xf32>
    %281 = arith.truncf %280 : vector<2x8x8xf32> to vector<2x8x8xbf16>
    %282 = vector.extract_strided_slice %216 {offsets = [0, 0, 56], sizes = [2, 8, 8], strides = [1, 1, 1]} : vector<2x8x96xf32> to vector<2x8x8xf32>
    %283 = arith.truncf %282 : vector<2x8x8xf32> to vector<2x8x8xbf16>
    %284 = vector.extract_strided_slice %216 {offsets = [0, 0, 88], sizes = [2, 8, 8], strides = [1, 1, 1]} : vector<2x8x96xf32> to vector<2x8x8xf32>
    %285 = arith.truncf %284 : vector<2x8x8xf32> to vector<2x8x8xbf16>
    "tpu.trace_start"() <{level = 10 : i32, message = "bqd,bkd->bqk"}> : () -> ()
    %cst_72 = arith.constant dense<0.000000e+00> : vector<2x8x8xf32>
    %286 = tpu.matmul %281, %283, %cst_72 {dimension_numbers = #tpu.dot_dimension_numbers<[2], [2], [1], [1], [0, 0, 0, 1, 1, 1], [0], [0]>} : vector<2x8x8xbf16>, vector<2x8x8xbf16>, vector<2x8x8xf32> -> vector<2x8x8xf32>
    "tpu.trace_stop"() : () -> ()
    %287 = vector.broadcast %15 : vector<2x1x8xf32> to vector<2x8x8xf32>
    %288 = arith.addf %286, %287 : vector<2x8x8xf32>
    %cst_73 = arith.constant dense<0xFF800000> : vector<2x8xf32>
    %289 = vector.multi_reduction <maximumf>, %288, %cst_73 [2] : vector<2x8x8xf32> to vector<2x8xf32>
    %290 = vector.shape_cast %289 : vector<2x8xf32> to vector<2x8x1xf32>
    %291 = vector.broadcast %290 : vector<2x8x1xf32> to vector<2x8x8xf32>
    %292 = arith.subf %288, %291 : vector<2x8x8xf32>
    %293 = math.exp %292 : vector<2x8x8xf32>
    %cst_74 = arith.constant dense<0.000000e+00> : vector<2x8xf32>
    %294 = vector.multi_reduction <add>, %293, %cst_74 [2] : vector<2x8x8xf32> to vector<2x8xf32>
    %295 = vector.shape_cast %294 : vector<2x8xf32> to vector<2x8x1xf32>
    %296 = tpu.reciprocal %295 {approx = true} : vector<2x8x1xf32> -> vector<2x8x1xf32>
    %297 = vector.broadcast %296 : vector<2x8x1xf32> to vector<2x8x8xf32>
    %298 = arith.mulf %293, %297 : vector<2x8x8xf32>
    %299 = arith.truncf %298 : vector<2x8x8xf32> to vector<2x8x8xbf16>
    "tpu.trace_start"() <{level = 10 : i32, message = "bqk,bkd->bqd"}> : () -> ()
    %cst_75 = arith.constant dense<0.000000e+00> : vector<2x8x8xf32>
    %300 = tpu.matmul %299, %285, %cst_75 {dimension_numbers = #tpu.dot_dimension_numbers<[2], [1], [1], [2], [0, 0, 0, 1, 1, 2], [0], [0]>} : vector<2x8x8xbf16>, vector<2x8x8xbf16>, vector<2x8x8xf32> -> vector<2x8x8xf32>
    "tpu.trace_stop"() : () -> ()
    %301 = tpu.concatenate %237, %258, %279, %300 in 2 : vector<2x8x8xf32>, vector<2x8x8xf32>, vector<2x8x8xf32>, vector<2x8x8xf32> -> vector<2x8x32xf32>
    %302 = vector.shape_cast %301 : vector<2x8x32xf32> to vector<16x32xf32>
    %303 = arith.truncf %302 : vector<16x32xf32> to vector<16x32xbf16>
    %cst_76 = arith.constant dense<0.000000e+00> : vector<16x32xf32>
    %304 = tpu.matmul %303, %175, %cst_76 {dimension_numbers = #tpu.dot_dimension_numbers<[1], [0], [0], [1], [0, 0, 1, 1], [], []>} : vector<16x32xbf16>, vector<32x32xbf16>, vector<16x32xf32> -> vector<16x32xf32>
    %305 = vector.broadcast %185 : vector<1x32xf32> to vector<16x32xf32>
    %306 = arith.addf %304, %305 : vector<16x32xf32>
    %307 = arith.addf %306, %171 : vector<16x32xf32>
    %cst_77 = arith.constant dense<0.000000e+00> : vector<16xf32>
    %308 = vector.multi_reduction <add>, %307, %cst_77 [1] : vector<16x32xf32> to vector<16xf32>
    %309 = vector.shape_cast %308 : vector<16xf32> to vector<16x1xf32>
    %cst_78 = arith.constant 3.200000e+01 : f32
    %310 = vector.broadcast %cst_78 : f32 to vector<16x1xf32>
    %311 = arith.divf %309, %310 : vector<16x1xf32>
    %312 = vector.broadcast %311 : vector<16x1xf32> to vector<16x32xf32>
    %313 = arith.subf %307, %312 : vector<16x32xf32>
    %314 = arith.mulf %313, %313 : vector<16x32xf32>
    %cst_79 = arith.constant dense<0.000000e+00> : vector<16xf32>
    %315 = vector.multi_reduction <add>, %314, %cst_79 [1] : vector<16x32xf32> to vector<16xf32>
    %316 = vector.shape_cast %315 : vector<16xf32> to vector<16x1xf32>
    %cst_80 = arith.constant 3.200000e+01 : f32
    %317 = vector.broadcast %cst_80 : f32 to vector<16x1xf32>
    %318 = arith.divf %316, %317 : vector<16x1xf32>
    %319 = vector.broadcast %311 : vector<16x1xf32> to vector<16x32xf32>
    %320 = arith.subf %307, %319 : vector<16x32xf32>
    %cst_81 = arith.constant 9.99999997E-7 : f32
    %321 = vector.broadcast %cst_81 : f32 to vector<16x1xf32>
    %322 = arith.addf %318, %321 : vector<16x1xf32>
    %323 = math.rsqrt %322 : vector<16x1xf32>
    %324 = vector.broadcast %323 : vector<16x1xf32> to vector<16x32xf32>
    %325 = arith.mulf %320, %324 : vector<16x32xf32>
    %326 = vector.broadcast %186 : vector<1x32xf32> to vector<16x32xf32>
    %327 = arith.mulf %325, %326 : vector<16x32xf32>
    %328 = vector.broadcast %187 : vector<1x32xf32> to vector<16x32xf32>
    %329 = arith.addf %327, %328 : vector<16x32xf32>
    %330 = arith.truncf %329 : vector<16x32xf32> to vector<16x32xbf16>
    %cst_82 = arith.constant dense<0.000000e+00> : vector<16x64xf32>
    %331 = tpu.matmul %330, %178, %cst_82 {dimension_numbers = #tpu.dot_dimension_numbers<[1], [0], [0], [1], [0, 0, 1, 1], [], []>} : vector<16x32xbf16>, vector<32x64xbf16>, vector<16x64xf32> -> vector<16x64xf32>
    %332 = vector.broadcast %188 : vector<1x64xf32> to vector<16x64xf32>
    %333 = arith.addf %331, %332 : vector<16x64xf32>
    %cst_83 = arith.constant 5.000000e-01 : f32
    %334 = vector.broadcast %cst_83 : f32 to vector<16x64xf32>
    %335 = arith.mulf %334, %333 : vector<16x64xf32>
    %336 = arith.mulf %333, %333 : vector<16x64xf32>
    %337 = arith.mulf %333, %336 : vector<16x64xf32>
    %cst_84 = arith.constant 4.471500e-02 : f32
    %338 = vector.broadcast %cst_84 : f32 to vector<16x64xf32>
    %339 = arith.mulf %338, %337 : vector<16x64xf32>
    %340 = arith.addf %333, %339 : vector<16x64xf32>
    %cst_85 = arith.constant 0.797884583 : f32
    %341 = vector.broadcast %cst_85 : f32 to vector<16x64xf32>
    %342 = arith.mulf %341, %340 : vector<16x64xf32>
    %343 = math.tanh %342 : vector<16x64xf32>
    %cst_86 = arith.constant 1.000000e+00 : f32
    %344 = vector.broadcast %cst_86 : f32 to vector<16x64xf32>
    %345 = arith.addf %344, %343 : vector<16x64xf32>
    %346 = arith.mulf %335, %345 : vector<16x64xf32>
    %347 = arith.truncf %346 : vector<16x64xf32> to vector<16x64xbf16>
    %cst_87 = arith.constant dense<0.000000e+00> : vector<16x32xf32>
    %348 = tpu.matmul %347, %179, %cst_87 {dimension_numbers = #tpu.dot_dimension_numbers<[1], [0], [0], [1], [0, 0, 1, 1], [], []>} : vector<16x64xbf16>, vector<64x32xbf16>, vector<16x32xf32> -> vector<16x32xf32>
    %349 = vector.broadcast %189 : vector<1x32xf32> to vector<16x32xf32>
    %350 = arith.addf %348, %349 : vector<16x32xf32>
    %351 = arith.addf %350, %307 : vector<16x32xf32>
    %c0_88 = arith.constant 0 : index
    %c0_89 = arith.constant 0 : index
    %352 = vector.load %arg8[%c0_88, %c0_89] : memref<8x32xf32, #tpu.memory_space<vmem>>, vector<1x32xf32>
    %c1_90 = arith.constant 1 : index
    %c0_91 = arith.constant 0 : index
    %353 = vector.load %arg8[%c1_90, %c0_91] : memref<8x32xf32, #tpu.memory_space<vmem>>, vector<1x32xf32>
    %c2 = arith.constant 2 : index
    %c0_92 = arith.constant 0 : index
    %354 = vector.load %arg8[%c2, %c0_92] : memref<8x32xf32, #tpu.memory_space<vmem>>, vector<1x32xf32>
    %c3 = arith.constant 3 : index
    %c0_93 = arith.constant 0 : index
    %355 = vector.load %arg8[%c3, %c0_93] : memref<8x32xf32, #tpu.memory_space<vmem>>, vector<1x1xf32>
    %cst_94 = arith.constant dense<0.000000e+00> : vector<16xf32>
    %356 = vector.multi_reduction <add>, %351, %cst_94 [1] : vector<16x32xf32> to vector<16xf32>
    %357 = vector.shape_cast %356 : vector<16xf32> to vector<16x1xf32>
    %cst_95 = arith.constant 3.200000e+01 : f32
    %358 = vector.broadcast %cst_95 : f32 to vector<16x1xf32>
    %359 = arith.divf %357, %358 : vector<16x1xf32>
    %360 = vector.broadcast %359 : vector<16x1xf32> to vector<16x32xf32>
    %361 = arith.subf %351, %360 : vector<16x32xf32>
    %362 = arith.mulf %361, %361 : vector<16x32xf32>
    %cst_96 = arith.constant dense<0.000000e+00> : vector<16xf32>
    %363 = vector.multi_reduction <add>, %362, %cst_96 [1] : vector<16x32xf32> to vector<16xf32>
    %364 = vector.shape_cast %363 : vector<16xf32> to vector<16x1xf32>
    %cst_97 = arith.constant 3.200000e+01 : f32
    %365 = vector.broadcast %cst_97 : f32 to vector<16x1xf32>
    %366 = arith.divf %364, %365 : vector<16x1xf32>
    %367 = vector.broadcast %359 : vector<16x1xf32> to vector<16x32xf32>
    %368 = arith.subf %351, %367 : vector<16x32xf32>
    %cst_98 = arith.constant 9.99999997E-7 : f32
    %369 = vector.broadcast %cst_98 : f32 to vector<16x1xf32>
    %370 = arith.addf %366, %369 : vector<16x1xf32>
    %371 = math.rsqrt %370 : vector<16x1xf32>
    %372 = vector.broadcast %371 : vector<16x1xf32> to vector<16x32xf32>
    %373 = arith.mulf %368, %372 : vector<16x32xf32>
    %374 = vector.broadcast %352 : vector<1x32xf32> to vector<16x32xf32>
    %375 = arith.mulf %373, %374 : vector<16x32xf32>
    %376 = vector.broadcast %353 : vector<1x32xf32> to vector<16x32xf32>
    %377 = arith.addf %375, %376 : vector<16x32xf32>
    %378 = tpu.transpose %377, [1, 0] : vector<16x32xf32> -> vector<32x16xf32>
    %cst_99 = arith.constant dense<0.000000e+00> : vector<1x16xf32>
    %379 = tpu.matmul %354, %378, %cst_99 {dimension_numbers = #tpu.dot_dimension_numbers<[1], [0], [0], [1], [0, 0, 1, 1], [], []>} : vector<1x32xf32>, vector<32x16xf32>, vector<1x16xf32> -> vector<1x16xf32>
    %380 = vector.broadcast %355 : vector<1x1xf32> to vector<1x16xf32>
    %381 = arith.addf %379, %380 : vector<1x16xf32>
    %c0_100 = arith.constant 0 : index
    %c0_101 = arith.constant 0 : index
    %c0_102 = arith.constant 0 : index
    %382 = vector.load %arg3[%c0_100, %c0_101, %c0_102] : memref<1x1x16xf32, #tpu.memory_space<vmem>>, vector<1x1x16xf32>
    %383 = vector.shape_cast %382 : vector<1x1x16xf32> to vector<1x16xf32>
    %cst_103 = arith.constant 0.000000e+00 : f32
    %384 = vector.broadcast %cst_103 : f32 to vector<1x16xf32>
    %385 = arith.subf %384, %381 : vector<1x16xf32>
    %386 = math.exp %385 : vector<1x16xf32>
    %cst_104 = arith.constant 1.000000e+00 : f32
    %387 = vector.broadcast %cst_104 : f32 to vector<1x16xf32>
    %388 = arith.addf %387, %386 : vector<1x16xf32>
    %389 = arith.divf %383, %388 : vector<1x16xf32>
    %390 = vector.shape_cast %389 : vector<1x16xf32> to vector<1x1x16xf32>
    %c0_105 = arith.constant 0 : index
    %c0_106 = arith.constant 0 : index
    %c0_107 = arith.constant 0 : index
    %391 = vector.load %arg9[%c0_105, %c0_106, %c0_107] : memref<1x1x16xf32, #tpu.memory_space<vmem>>, vector<1x1x16xf32>
    tpu.vector_store %arg9[%c0_105, %c0_106, %c0_107], %390 {strides = array<i32>} : memref<1x1x16xf32, #tpu.memory_space<vmem>>, vector<1x1x16xf32>,
    return
  }
  func.func @transform_0(%arg0: i32) -> (i32, i32, i32) {
    %c0_i32 = arith.constant 0 : i32
    %c0_i32_0 = arith.constant 0 : i32
    %c0_i32_1 = arith.constant 0 : i32
    return %arg0, %c0_i32, %c0_i32_0 : i32, i32, i32
  }
  func.func @transform_1(%arg0: i32) -> (i32, i32, i32) {
    %c0_i32 = arith.constant 0 : i32
    %c0_i32_0 = arith.constant 0 : i32
    %c0_i32_1 = arith.constant 0 : i32
    return %arg0, %c0_i32, %c0_i32_0 : i32, i32, i32
  }
  func.func @transform_2(%arg0: i32) -> (i32, i32, i32) {
    %c0_i32 = arith.constant 0 : i32
    %c0_i32_0 = arith.constant 0 : i32
    %c0_i32_1 = arith.constant 0 : i32
    return %arg0, %c0_i32, %c0_i32_0 : i32, i32, i32
  }
  func.func @transform_3(%arg0: i32) -> (i32, i32) {
    %c0_i32 = arith.constant 0 : i32
    %c0_i32_0 = arith.constant 0 : i32
    %c0_i32_1 = arith.constant 0 : i32
    return %c0_i32, %c0_i32_0 : i32, i32
  }
  func.func @transform_4(%arg0: i32) -> (i32, i32, i32) {
    %c0_i32 = arith.constant 0 : i32
    %c0_i32_0 = arith.constant 0 : i32
    %c0_i32_1 = arith.constant 0 : i32
    %c0_i32_2 = arith.constant 0 : i32
    return %c0_i32, %c0_i32_0, %c0_i32_1 : i32, i32, i32
  }
  func.func @transform_5(%arg0: i32) -> (i32, i32, i32) {
    %c0_i32 = arith.constant 0 : i32
    %c0_i32_0 = arith.constant 0 : i32
    %c0_i32_1 = arith.constant 0 : i32
    %c0_i32_2 = arith.constant 0 : i32
    return %c0_i32, %c0_i32_0, %c0_i32_1 : i32, i32, i32
  }
  func.func @transform_6(%arg0: i32) -> (i32, i32, i32) {
    %c0_i32 = arith.constant 0 : i32
    %c0_i32_0 = arith.constant 0 : i32
    %c0_i32_1 = arith.constant 0 : i32
    %c0_i32_2 = arith.constant 0 : i32
    return %c0_i32, %c0_i32_0, %c0_i32_1 : i32, i32, i32
  }
  func.func @transform_7(%arg0: i32) -> (i32, i32) {
    %c0_i32 = arith.constant 0 : i32
    %c0_i32_0 = arith.constant 0 : i32
    %c0_i32_1 = arith.constant 0 : i32
    return %c0_i32, %c0_i32_0 : i32, i32
  }
  func.func @transform_8(%arg0: i32) -> (i32, i32, i32) {
    %c0_i32 = arith.constant 0 : i32
    %c0_i32_0 = arith.constant 0 : i32
    %c0_i32_1 = arith.constant 0 : i32
    return %arg0, %c0_i32, %c0_i32_0 : i32, i32, i32
  }
}

</mosaic_0001>

<bundles_post_ra>
// kernel: tpu_custom_call.1
= control target key start
LH: loop header
LB: loop body
LE: loop exit
PB: predicated region body
PF: predicated region fallthrough
CT: control target
= control target key end

     0   :  { %v35_v0 = vlaneseq  ;;  %v3368_v1 = vmov 0.0   ;;  %vm3369_vm0 = vmmov 0   ;;  %s4063_s0 = inlined_call_operand.vmem [shape: f32[2,8,32], index: 0, kind: input, shape index: {}]   ;;  %s4064_s1 = inlined_call_operand.vmem [shape: f32[2,1,8], index: 1, kind: input, shape index: {}]   ;;  %s4065_s2 = inlined_call_operand.vmem [shape: f32[1,1,16], index: 2, kind: input, shape index: {}]   ;;  %s4066_s3 = inlined_call_operand.vmem [shape: f32[8,32], index: 3, kind: input, shape index: {}]   ;;  %s4067_s4 = inlined_call_operand.vmem [shape: bf16[2,32,128], index: 4, kind: input, shape index: {}]   ;;  %s4068_s5 = inlined_call_operand.vmem [shape: bf16[2,96,64], index: 5, kind: input, shape index: {}]   ;;  %s4069_s6 = inlined_call_operand.vmem [shape: f32[2,8,96], index: 6, kind: input, shape index: {}]   ;;  %s4070_s7 = inlined_call_operand.vmem [shape: f32[8,32], index: 7, kind: input, shape index: {}]   ;;  %s4071_s8 = inlined_call_operand.hbm [shape: f32[1,1,16], index: 8, kind: output, shape index: {}]  }
   0x1   :  { %2916 = vmatprep.subr.bf16.mxu1 %v3368_v1  ;;  %v3436_v2 = vld [vmem:[%s4067_s4 + $0x8] sm:$0xff]   ;;  %2930 = vmatprep.subr.bf16.mxu0 %v3368_v1  ;;  %v31_v4 = vld [vmem:[%s4064_s1] sm:$0x1]  ;;  %v32_v7 = vld [vmem:[%s4064_s1 + $0x1] sm:$0x1] }
   0x2   :  { %v3439_v3 = vshrl.u32 %v35_v0, 7  ;;  %2917 = vmatpush3.bf16.msra.mxu1 %v3436_v2  ;;  %v3452_v6 = vld [vmem:[%s4067_s4] sm:$0xff]   ;;  %2920 = vmatprep.mubr.msk.bf16.mxu1 %vm3369_vm0, %v3368_v1 }
   0x3   :  { %2918 = vmatprep.subr.bf16.mxu1 %v3368_v1  ;;  %2932 = vmatprep.mubr.msk.bf16.mxu0 %vm3369_vm0, %v3368_v1 }
   0x4   :  { %v3446_v5 = vsub.s32 0, %v3439_v3 }
   0x6   :  { %v38_v8 = vrot.slane %v31_v4, %v3446_v5  ;;  %2919 = vmatpush3.bf16.msra.mxu1 %v3452_v6  ;;  %v45_v9 = vrot.slane %v32_v7, %v3446_v5 }
   0x7   :  { %2924 = vmatprep.subr.bf16.mxu1 %v3368_v1 }
   0x8   :  { %40 = vbcast.lane.b32.xlu0 %v38_v8, 256 }
   0xc   :  { %47 = vbcast.lane.b32.xlu0 %v45_v9, 256 }
   0xd   :  { %13 = vsyncpa [#allocation3], 0  ;;  %v33_v10 = vld [vmem:[%s4063_s0] sm:$0xff]  ;;  %v34_v12 = vld [vmem:[%s4063_s0 + $0x8] sm:$0xff]  ;;  %vm92_vm1 = vcmask 261120   ;;  %v78_v20 = vsub.s32 2, %v3439_v3 }
   0xe   :  { %v51_v14 = vld [vmem:[%s4066_s3] sm:$0xff]  ;;  %s3370_s3 = smov 96   ;;  %vm154_vm2 = vcmask 64512   ;;  %v2741_v35 = vadd.f32 -1.0, %v31_v4  ;;  %v2742_v37 = vadd.f32 -1.0, %v32_v7  ;;  %s3371_s19 = smov 64  }
   0xf   :  { %v3487_v21 = vld [vmem:[%s4069_s6] sm:$0xff]  ;;  %s3372_s20 = smov 88   ;;  %s3373_s21 = smov 120   ;;  %vm279_vm3 = vcmask 1043456   ;;  %vm1057_vm4 = vcmask 130048   ;;  %vm1060_vm5 = vcmask 195584  }
  0x10   :  { %v79_v22 = vrot.slane %v3487_v21, %v78_v20  ;;  %v56_v36 = vmul.f32 1e+18, %v2741_v35  ;;  %v57_v39 = vmul.f32 1e+18, %v2742_v37  ;;  %s3374_s22 = smov 56   ;;  %s3375_s23 = smov 80  }
  0x11   :  { %s3376_s24 = smov 112   ;;  %s3377_s25 = smov 48   ;;  %vm1267_vm6 = vcmask 523264   ;;  %vm2725_vm7 = vcmask 122880  }
  0x12   :  { %v3513_v38 = vrot.slane %v56_v36, %v3446_v5  ;;  %v3516_v41 = vrot.slane %v57_v39, %v3446_v5  ;;  %s3378_s26 = smov 72   ;;  %s3379_s27 = smov 104  }
  0x13   :  { %s3380_s28 = smov 40   ;;  %s3381_s29 = smov 32  }
  0x14   :  { %s3382_s30 = smov 8   ;;  %s3383_s9 = smov 16  }
  0x15   :  { %s3384_s10 = smov 24   ;;  %s3386_s13 = smov [#allocation2]  }
  0x16   :  { %s2733_s1 = sshll.u32 %s3386_s13, 4  ;;  %s2734_s1 = int_to_ptr.vmem [resolvable:$true] %s2733_s1 }
  0x17   :  { %s3350_s14 = scalar_lea.vmem %s2734_s1, 32  ;;  %p3351_p1 = scmp.lt.s32.totalorder %s2734_s1, %s2734_s1 }
  0x7a   :  { %v41_v11 = vpop.permute.xlu0 %40 }
  0x7b   :  { %v49_v13 = vmul.f32 %v41_v11, %v33_v10 }
  0x7d   :  { %v3474_v17 = vadd.f32 %v51_v14, %v49_v13 }
  0x7e   :  { %v48_v15 = vpop.permute.xlu0 %47 }
  0x7f   :  { %v50_v16 = vmul.f32 %v48_v15, %v34_v12 }
  0x81   :  { %v3476_v18 = vadd.f32 %v51_v14, %v50_v16 }
  0x83   :  { %v75_v19 = vpack.c.bf16 %v3476_v18, %v3474_v17 }
  0x85   :  { %2921 = vmatmul.mubr.msk.bf16.vlgmr.msra.gmra.mxu1 %vm92_vm1, %v75_v19 }
  0x86   :  { %2926 = vmatprep.mubr.msk.bf16.mxu1 %vm3369_vm0, %v3368_v1 }
 0x145   :  { %v130_v23 = vpop.f32.mrf.mxu1 }
 0x146   :  { %v131_v24 = vadd.f32 %v130_v23, %v79_v22 }
 0x147   :  { %v2922_v25 = vpop.f32.mrf.mxu1 }
 0x148   :  { %v3492_v26 = vpack.c.bf16 %v131_v24, %v131_v24 }
 0x149   :  { %v133_v27 = vpop.f32.mrf.mxu1 }
 0x14a   :  { %v134_v28 = vadd.f32 %v133_v27, %v79_v22  ;;  %152 = vrot.lane.b32.xlu1 %v3492_v26, %s3370_s3 }
 0x14b   :  { %v2923_v29 = vpop.f32.mrf.mxu1 }
 0x14c   :  { %v3496_v30 = vpack.c.bf16 %v134_v28, %v134_v28 }
 0x14e   :  { %202 = vrot.lane.b32.xlu1 %v3496_v30, %s3370_s3 }
 0x1bc   :  { %v153_v31 = vpop.permute.xlu1 %152 }
 0x1bd   :  { %v159_v32 = vsel %vm154_vm2, %v153_v31, 0 }
 0x1be   :  { %2925 = vmatpush3.bf16.xpose.msra.mxu1 %v159_v32 }
 0x1bf   :  { %2936 = vmatprep.subr.bf16.mxu1 %v3368_v1 }
 0x1c0   :  { %v203_v33 = vpop.permute.xlu1 %202 }
 0x1c1   :  { %v208_v34 = vsel %vm154_vm2, %v203_v33, 0 }
 0x1c2   :  { %2931 = vmatpush3.bf16.xpose.msra.mxu0 %v208_v34 }
 0x1c3   :  { %2942 = vmatprep.subr.bf16.mxu0 %v3368_v1 }
 0x1c5   :  { %2927 = vmatmul.mubr.msk.bf16.vlgmr.msra.gmra.mxu1 %vm154_vm2, %v3492_v26 }
 0x1c6   :  { %2938 = vmatprep.mubr.msk.bf16.mxu1 %vm3369_vm0, %v3368_v1 }
 0x1c9   :  { %2933 = vmatmul.mubr.msk.bf16.vlgmr.msra.gmra.mxu0 %vm154_vm2, %v3496_v30 }
 0x1ca   :  { %2944 = vmatprep.mubr.msk.bf16.mxu0 %vm3369_vm0, %v3368_v1 }
 0x285   :  { %v195_v40 = vpop.f32.mrf.mxu1 }
 0x286   :  { %v196_v42 = vadd.f32 %v195_v40, %v3513_v38 }
 0x287   :  { %v2928_v43 = vpop.f32.mrf.mxu1 }
 0x288   :  { %v250_v44 = vsel %vm154_vm2, %v196_v42, -inf }
 0x289   :  { %v244_v45 = vpop.f32.mrf.mxu0  ;;  %251 = vmax.xlane.f32.xlu0 %v250_v44  ;;  %v198_v46 = vpop.f32.mrf.mxu1 }
 0x28a   :  { %v245_v47 = vadd.f32 %v244_v45, %v3516_v41 }
 0x28b   :  { %v2929_v48 = vpop.f32.mrf.mxu1  ;;  %v2934_v49 = vpop.f32.mrf.mxu0 }
 0x28c   :  { %v253_v50 = vsel %vm154_vm2, %v245_v47, -inf }
 0x28d   :  { %254 = vmax.xlane.f32.xlu1 %v253_v50  ;;  %v247_v51 = vpop.f32.mrf.mxu0 }
 0x28f   :  { %v2935_v52 = vpop.f32.mrf.mxu0 }
 0x29e   :  { %274 = vrot.lane.b32.xlu1 %v3492_v26, %s3371_s19 }
 0x2a2   :  { %373 = vrot.lane.b32.xlu1 %v3492_v26, %s3372_s20 }
 0x2a6   :  { %423 = vrot.lane.b32.xlu1 %v3496_v30, %s3372_s20 }
 0x2aa   :  { %421 = vrot.lane.b32.xlu1 %v3496_v30, %s3373_s21 }
 0x312   :  { %v252_v53 = vpop.xlane.xlu0 %251 }
 0x313   :  { %v256_v54 = vsub.f32 %v196_v42, %v252_v53 }
 0x315   :  { %v258_v55 = vmul.f32 1.442695, %v256_v54 }
 0x316   :  { %v255_v56 = vpop.xlane.xlu1 %254 }
 0x317   :  { %3254 = vpow2.f32 %v258_v55  ;;  %v257_v57 = vsub.f32 %v245_v47, %v255_v56 }
 0x319   :  { %v260_v58 = vmul.f32 1.442695, %v257_v57 }
 0x31a   :  { %v275_v59 = vpop.permute.xlu1 %274 }
 0x31b   :  { %3256 = vpow2.f32 %v260_v58  ;;  %v281_v60 = vsel %vm279_vm3, %v275_v59, 0 }
 0x31c   :  { %2937 = vmatpush3.bf16.msra.mxu1 %v281_v60 }
 0x31d   :  { %2948 = vmatprep.subr.bf16.mxu1 %v3368_v1 }
 0x31e   :  { %v374_v11 = vpop.permute.xlu1 %373 }
 0x31f   :  { %v379_v15 = vsel %vm154_vm2, %v374_v11, 0 }
 0x322   :  { %v424_v19 = vpop.permute.xlu1 %423 }
 0x323   :  { %v429_v23 = vsel %vm154_vm2, %v424_v19, 0 }
 0x324   :  { %v3255_v61 = vpop.eup %3254 }
 0x325   :  { %v262_v62 = vsel %vm154_vm2, %v3255_v61, 0.0 }
 0x326   :  { %263 = vadd.xlane.f32.xlu0 %v262_v62  ;;  %v422_v25 = vpop.permute.xlu1 %421 }
 0x328   :  { %v3257_v63 = vpop.eup %3256 }
 0x329   :  { %v265_v0 = vsel %vm154_vm2, %v3257_v63, 0.0 }
 0x32a   :  { %266 = vadd.xlane.f32.xlu0 %v265_v0 }
 0x340   :  { %323 = vrot.lane.b32.xlu0 %v3496_v30, %s3371_s19 }
 0x344   :  { %371 = vrot.lane.b32.xlu0 %v3492_v26, %s3373_s21 }
 0x3af   :  { %v264_v4 = vpop.xlane.xlu0 %263 }
 0x3b0   :  { %3258 = vrcp.f32 %v264_v4 }
 0x3b3   :  { %v267_v7 = vpop.xlane.xlu0 %266 }
 0x3b4   :  { %3260 = vrcp.f32 %v267_v7 }
 0x3b7   :  { %v324_v8 = vpop.permute.xlu0 %323 }
 0x3b8   :  { %v329_v9 = vsel %vm279_vm3, %v324_v8, 0 }
 0x3b9   :  { %2943 = vmatpush3.bf16.msra.mxu0 %v329_v9 }
 0x3ba   :  { %2954 = vmatprep.subr.bf16.mxu0 %v3368_v1 }
 0x3bb   :  { %v372_v24 = vpop.permute.xlu0 %371 }
 0x3bd   :  { %v3259_v10 = vpop.eup %3258 }
 0x3be   :  { %v270_v12 = vmul.f32 %v3259_v10, %v3255_v61 }
 0x3c0   :  { %v272_v13 = vpack.c.bf16 %v270_v12, %v270_v12 }
 0x3c1   :  { %v3261_v14 = vpop.eup %3260 }
 0x3c2   :  { %2939 = vmatmul.mubr.msk.bf16.vlgmr.msra.gmra.mxu1 %vm154_vm2, %v272_v13  ;;  %v271_v16 = vmul.f32 %v3261_v14, %v3257_v63 }
 0x3c3   :  { %2949 = vmatpush3.bf16.xpose.msra.mxu1 %v379_v15  ;;  %2950 = vmatprep.mubr.msk.bf16.mxu1 %vm3369_vm0, %v3368_v1 }
 0x3c4   :  { %v273_v22 = vpack.c.bf16 %v271_v16, %v271_v16  ;;  %2960 = vmatprep.subr.bf16.mxu1 %v3368_v1 }
 0x3c6   :  { %2945 = vmatmul.mubr.msk.bf16.vlgmr.msra.gmra.mxu0 %vm154_vm2, %v273_v22 }
 0x3c7   :  { %2955 = vmatpush3.bf16.xpose.msra.mxu0 %v429_v23  ;;  %2956 = vmatprep.mubr.msk.bf16.mxu0 %vm3369_vm0, %v3368_v1 }
 0x3c8   :  { %2966 = vmatprep.subr.bf16.mxu0 %v3368_v1 }
 0x3ca   :  { %2951 = vmatmul.mubr.msk.bf16.vlgmr.msra.gmra.mxu1 %vm154_vm2, %v372_v24 }
 0x3cb   :  { %2962 = vmatprep.mubr.msk.bf16.mxu1 %vm3369_vm0, %v3368_v1 }
 0x3ce   :  { %2957 = vmatmul.mubr.msk.bf16.vlgmr.msra.gmra.mxu0 %vm154_vm2, %v422_v25 }
 0x3cf   :  { %2968 = vmatprep.mubr.msk.bf16.mxu0 %vm3369_vm0, %v3368_v1 }
 0x482   :  { %v3556_v27 = vpop.f32.mrf.mxu1 }
 0x484   :  { %v2940_v28 = vpop.f32.mrf.mxu1 }
 0x486   :  { %v320_v29 = vpop.f32.mrf.mxu1  ;;  %v3558_v31 = vpop.f32.mrf.mxu0 }
 0x488   :  { %v2941_v32 = vpop.f32.mrf.mxu1  ;;  %v2946_v33 = vpop.f32.mrf.mxu0 }
 0x48a   :  { %v368_v34 = vpop.f32.mrf.mxu0  ;;  %v415_v35 = vpop.f32.mrf.mxu1 }
 0x48b   :  { %v416_v36 = vadd.f32 %v415_v35, %v3513_v38 }
 0x48c   :  { %v2947_v37 = vpop.f32.mrf.mxu0  ;;  %v2952_v39 = vpop.f32.mrf.mxu1 }
 0x48d   :  { %v471_v40 = vsel %vm154_vm2, %v416_v36, -inf }
 0x48e   :  { %v465_v42 = vpop.f32.mrf.mxu0  ;;  %472 = vmax.xlane.f32.xlu0 %v471_v40  ;;  %v418_v43 = vpop.f32.mrf.mxu1 }
 0x48f   :  { %v466_v44 = vadd.f32 %v465_v42, %v3516_v41 }
 0x490   :  { %v2953_v45 = vpop.f32.mrf.mxu1  ;;  %v2958_v46 = vpop.f32.mrf.mxu0 }
 0x491   :  { %v474_v47 = vsel %vm154_vm2, %v466_v44, -inf }
 0x492   :  { %475 = vmax.xlane.f32.xlu1 %v474_v47  ;;  %v468_v48 = vpop.f32.mrf.mxu0 }
 0x494   :  { %v2959_v49 = vpop.f32.mrf.mxu0 }
 0x4a3   :  { %495 = vrot.lane.b32.xlu1 %v3492_v26, %s3374_s22 }
 0x4a7   :  { %593 = vrot.lane.b32.xlu1 %v3492_v26, %s3375_s23 }
 0x4ab   :  { %643 = vrot.lane.b32.xlu1 %v3496_v30, %s3375_s23 }
 0x4af   :  { %641 = vrot.lane.b32.xlu1 %v3496_v30, %s3376_s24 }
 0x517   :  { %v473_v50 = vpop.xlane.xlu0 %472 }
 0x518   :  { %v477_v51 = vsub.f32 %v416_v36, %v473_v50 }
 0x51a   :  { %v479_v52 = vmul.f32 1.442695, %v477_v51 }
 0x51b   :  { %v476_v53 = vpop.xlane.xlu1 %475 }
 0x51c   :  { %3262 = vpow2.f32 %v479_v52  ;;  %v478_v54 = vsub.f32 %v466_v44, %v476_v53 }
 0x51e   :  { %v481_v55 = vmul.f32 1.442695, %v478_v54 }
 0x51f   :  { %v496_v56 = vpop.permute.xlu1 %495 }
 0x520   :  { %3264 = vpow2.f32 %v481_v55  ;;  %v501_v57 = vsel %vm279_vm3, %v496_v56, 0 }
 0x521   :  { %2961 = vmatpush3.bf16.msra.mxu1 %v501_v57 }
 0x522   :  { %2972 = vmatprep.subr.bf16.mxu1 %v3368_v1 }
 0x523   :  { %v594_v8 = vpop.permute.xlu1 %593 }
 0x524   :  { %v599_v12 = vsel %vm154_vm2, %v594_v8, 0 }
 0x527   :  { %v644_v14 = vpop.permute.xlu1 %643 }
 0x528   :  { %v649_v16 = vsel %vm154_vm2, %v644_v14, 0 }
 0x529   :  { %v3263_v58 = vpop.eup %3262 }
 0x52a   :  { %v483_v59 = vsel %vm154_vm2, %v3263_v58, 0.0 }
 0x52b   :  { %484 = vadd.xlane.f32.xlu0 %v483_v59  ;;  %v642_v22 = vpop.permute.xlu1 %641 }
 0x52d   :  { %v3265_v60 = vpop.eup %3264 }
 0x52e   :  { %v486_v61 = vsel %vm154_vm2, %v3265_v60, 0.0 }
 0x52f   :  { %487 = vadd.xlane.f32.xlu0 %v486_v61 }
 0x545   :  { %543 = vrot.lane.b32.xlu0 %v3496_v30, %s3374_s22 }
 0x549   :  { %591 = vrot.lane.b32.xlu0 %v3492_v26, %s3376_s24 }
 0x5b4   :  { %v485_v62 = vpop.xlane.xlu0 %484 }
 0x5b5   :  { %3266 = vrcp.f32 %v485_v62 }
 0x5b8   :  { %v488_v63 = vpop.xlane.xlu0 %487 }
 0x5b9   :  { %3268 = vrcp.f32 %v488_v63 }
 0x5bc   :  { %v544_v0 = vpop.permute.xlu0 %543 }
 0x5bd   :  { %v549_v4 = vsel %vm279_vm3, %v544_v0, 0 }
 0x5be   :  { %2967 = vmatpush3.bf16.msra.mxu0 %v549_v4 }
 0x5bf   :  { %2978 = vmatprep.subr.bf16.mxu0 %v3368_v1 }
 0x5c0   :  { %v592_v19 = vpop.permute.xlu0 %591 }
 0x5c2   :  { %v3267_v7 = vpop.eup %3266 }
 0x5c3   :  { %v491_v9 = vmul.f32 %v3267_v7, %v3263_v58 }
 0x5c5   :  { %v493_v10 = vpack.c.bf16 %v491_v9, %v491_v9 }
 0x5c6   :  { %v3269_v11 = vpop.eup %3268 }
 0x5c7   :  { %2963 = vmatmul.mubr.msk.bf16.vlgmr.msra.gmra.mxu1 %vm154_vm2, %v493_v10  ;;  %v492_v13 = vmul.f32 %v3269_v11, %v3265_v60 }
 0x5c8   :  { %2973 = vmatpush3.bf16.xpose.msra.mxu1 %v599_v12  ;;  %2974 = vmatprep.mubr.msk.bf16.mxu1 %vm3369_vm0, %v3368_v1 }
 0x5c9   :  { %v494_v15 = vpack.c.bf16 %v492_v13, %v492_v13  ;;  %2984 = vmatprep.subr.bf16.mxu1 %v3368_v1 }
 0x5cb   :  { %2969 = vmatmul.mubr.msk.bf16.vlgmr.msra.gmra.mxu0 %vm154_vm2, %v494_v15 }
 0x5cc   :  { %2979 = vmatpush3.bf16.xpose.msra.mxu0 %v649_v16  ;;  %2980 = vmatprep.mubr.msk.bf16.mxu0 %vm3369_vm0, %v3368_v1 }
 0x5cd   :  { %2990 = vmatprep.subr.bf16.mxu0 %v3368_v1 }
 0x5cf   :  { %2975 = vmatmul.mubr.msk.bf16.vlgmr.msra.gmra.mxu1 %vm154_vm2, %v592_v19 }
 0x5d0   :  { %2986 = vmatprep.mubr.msk.bf16.mxu1 %vm3369_vm0, %v3368_v1 }
 0x5d3   :  { %2981 = vmatmul.mubr.msk.bf16.vlgmr.msra.gmra.mxu0 %vm154_vm2, %v642_v22 }
 0x5d4   :  { %2992 = vmatprep.mubr.msk.bf16.mxu0 %vm3369_vm0, %v3368_v1 }
 0x687   :  { %v3598_v23 = vpop.f32.mrf.mxu1 }
 0x689   :  { %v2964_v24 = vpop.f32.mrf.mxu1 }
 0x68b   :  { %v540_v25 = vpop.f32.mrf.mxu1  ;;  %v3600_v28 = vpop.f32.mrf.mxu0 }
 0x68c   :  { %v3206_v29 = vpack.i.bf16 %v3600_v28, %v3598_v23 }
 0x68d   :  { %v2965_v32 = vpop.f32.mrf.mxu1  ;;  %v2970_v33 = vpop.f32.mrf.mxu0 }
 0x68f   :  { %v588_v34 = vpop.f32.mrf.mxu0  ;;  %v635_v35 = vpop.f32.mrf.mxu1 }
 0x690   :  { %v636_v36 = vadd.f32 %v635_v35, %v3513_v38 }
 0x691   :  { %v2971_v37 = vpop.f32.mrf.mxu0  ;;  %v2976_v39 = vpop.f32.mrf.mxu1 }
 0x692   :  { %v691_v40 = vsel %vm154_vm2, %v636_v36, -inf }
 0x693   :  { %v685_v42 = vpop.f32.mrf.mxu0  ;;  %692 = vmax.xlane.f32.xlu0 %v691_v40  ;;  %v638_v43 = vpop.f32.mrf.mxu1 }
 0x694   :  { %v686_v44 = vadd.f32 %v685_v42, %v3516_v41 }
 0x695   :  { %v2977_v45 = vpop.f32.mrf.mxu1  ;;  %v2982_v46 = vpop.f32.mrf.mxu0 }
 0x696   :  { %v694_v47 = vsel %vm154_vm2, %v686_v44, -inf }
 0x697   :  { %695 = vmax.xlane.f32.xlu1 %v694_v47  ;;  %v688_v48 = vpop.f32.mrf.mxu0 }
 0x699   :  { %v2983_v49 = vpop.f32.mrf.mxu0 }
 0x6a8   :  { %715 = vrot.lane.b32.xlu1 %v3492_v26, %s3377_s25 }
 0x6ac   :  { %813 = vrot.lane.b32.xlu1 %v3492_v26, %s3378_s26 }
 0x6b0   :  { %863 = vrot.lane.b32.xlu1 %v3496_v30, %s3378_s26 }
 0x6b4   :  { %861 = vrot.lane.b32.xlu1 %v3496_v30, %s3379_s27 }
 0x71c   :  { %v693_v50 = vpop.xlane.xlu0 %692 }
 0x71d   :  { %v697_v51 = vsub.f32 %v636_v36, %v693_v50 }
 0x71f   :  { %v699_v52 = vmul.f32 1.442695, %v697_v51 }
 0x720   :  { %v696_v53 = vpop.xlane.xlu1 %695 }
 0x721   :  { %3270 = vpow2.f32 %v699_v52  ;;  %v698_v54 = vsub.f32 %v686_v44, %v696_v53 }
 0x723   :  { %v701_v55 = vmul.f32 1.442695, %v698_v54 }
 0x724   :  { %v716_v56 = vpop.permute.xlu1 %715 }
 0x725   :  { %3272 = vpow2.f32 %v701_v55  ;;  %v721_v57 = vsel %vm279_vm3, %v716_v56, 0 }
 0x726   :  { %2985 = vmatpush3.bf16.msra.mxu1 %v721_v57 }
 0x727   :  { %2996 = vmatprep.subr.bf16.mxu1 %v3368_v1 }
 0x728   :  { %v814_v8 = vpop.permute.xlu1 %813 }
 0x729   :  { %v819_v12 = vsel %vm154_vm2, %v814_v8, 0 }
 0x72c   :  { %v864_v14 = vpop.permute.xlu1 %863 }
 0x72d   :  { %v869_v16 = vsel %vm154_vm2, %v864_v14, 0 }
 0x72e   :  { %v3271_v58 = vpop.eup %3270 }
 0x72f   :  { %v703_v59 = vsel %vm154_vm2, %v3271_v58, 0.0 }
 0x730   :  { %704 = vadd.xlane.f32.xlu0 %v703_v59  ;;  %v862_v22 = vpop.permute.xlu1 %861 }
 0x732   :  { %v3273_v60 = vpop.eup %3272 }
 0x733   :  { %v706_v61 = vsel %vm154_vm2, %v3273_v60, 0.0 }
 0x734   :  { %707 = vadd.xlane.f32.xlu0 %v706_v61 }
 0x74a   :  { %763 = vrot.lane.b32.xlu0 %v3496_v30, %s3377_s25 }
 0x74e   :  { %811 = vrot.lane.b32.xlu0 %v3492_v26, %s3379_s27 }
 0x7b9   :  { %v705_v62 = vpop.xlane.xlu0 %704 }
 0x7ba   :  { %3274 = vrcp.f32 %v705_v62 }
 0x7bd   :  { %v708_v63 = vpop.xlane.xlu0 %707 }
 0x7be   :  { %3276 = vrcp.f32 %v708_v63 }
 0x7c1   :  { %v764_v0 = vpop.permute.xlu0 %763 }
 0x7c2   :  { %v769_v4 = vsel %vm279_vm3, %v764_v0, 0 }
 0x7c3   :  { %2991 = vmatpush3.bf16.msra.mxu0 %v769_v4 }
 0x7c4   :  { %3002 = vmatprep.subr.bf16.mxu0 %v3368_v1 }
 0x7c5   :  { %v812_v19 = vpop.permute.xlu0 %811 }
 0x7c7   :  { %v3275_v7 = vpop.eup %3274 }
 0x7c8   :  { %v711_v9 = vmul.f32 %v3275_v7, %v3271_v58 }
 0x7ca   :  { %v713_v10 = vpack.c.bf16 %v711_v9, %v711_v9 }
 0x7cb   :  { %v3277_v11 = vpop.eup %3276 }
 0x7cc   :  { %2987 = vmatmul.mubr.msk.bf16.vlgmr.msra.gmra.mxu1 %vm154_vm2, %v713_v10  ;;  %v712_v13 = vmul.f32 %v3277_v11, %v3273_v60 }
 0x7cd   :  { %2997 = vmatpush3.bf16.xpose.msra.mxu1 %v819_v12  ;;  %2998 = vmatprep.mubr.msk.bf16.mxu1 %vm3369_vm0, %v3368_v1 }
 0x7ce   :  { %v714_v15 = vpack.c.bf16 %v712_v13, %v712_v13  ;;  %3008 = vmatprep.subr.bf16.mxu1 %v3368_v1 }
 0x7d0   :  { %2993 = vmatmul.mubr.msk.bf16.vlgmr.msra.gmra.mxu0 %vm154_vm2, %v714_v15 }
 0x7d1   :  { %3003 = vmatpush3.bf16.xpose.msra.mxu0 %v869_v16  ;;  %3004 = vmatprep.mubr.msk.bf16.mxu0 %vm3369_vm0, %v3368_v1 }
 0x7d2   :  { %3014 = vmatprep.subr.bf16.mxu0 %v3368_v1 }
 0x7d4   :  { %2999 = vmatmul.mubr.msk.bf16.vlgmr.msra.gmra.mxu1 %vm154_vm2, %v812_v19 }
 0x7d5   :  { %3010 = vmatprep.mubr.msk.bf16.mxu1 %vm3369_vm0, %v3368_v1 }
 0x7d8   :  { %3005 = vmatmul.mubr.msk.bf16.vlgmr.msra.gmra.mxu0 %vm154_vm2, %v862_v22 }
 0x7d9   :  { %3016 = vmatprep.mubr.msk.bf16.mxu0 %vm3369_vm0, %v3368_v1 }
 0x88c   :  { %v757_v24 = vpop.f32.mrf.mxu1 }
 0x88e   :  { %v2988_v25 = vpop.f32.mrf.mxu1 }
 0x890   :  { %v760_v32 = vpop.f32.mrf.mxu1  ;;  %v805_v33 = vpop.f32.mrf.mxu0 }
 0x891   :  { %v3211_v34 = vpack.i.bf16 %v805_v33, %v757_v24 }
 0x892   :  { %v2989_v35 = vpop.f32.mrf.mxu1  ;;  %v2994_v36 = vpop.f32.mrf.mxu0 }
 0x894   :  { %v808_v37 = vpop.f32.mrf.mxu0  ;;  %v855_v39 = vpop.f32.mrf.mxu1 }
 0x895   :  { %v856_v40 = vadd.f32 %v855_v39, %v3513_v38 }
 0x896   :  { %v2995_v42 = vpop.f32.mrf.mxu0  ;;  %v3000_v43 = vpop.f32.mrf.mxu1 }
 0x897   :  { %v911_v44 = vsel %vm154_vm2, %v856_v40, -inf }
 0x898   :  { %v905_v45 = vpop.f32.mrf.mxu0  ;;  %912 = vmax.xlane.f32.xlu0 %v911_v44  ;;  %v858_v46 = vpop.f32.mrf.mxu1 }
 0x899   :  { %v906_v47 = vadd.f32 %v905_v45, %v3516_v41 }
 0x89a   :  { %v3001_v48 = vpop.f32.mrf.mxu1  ;;  %v3006_v49 = vpop.f32.mrf.mxu0 }
 0x89b   :  { %v914_v50 = vsel %vm154_vm2, %v906_v47, -inf }
 0x89c   :  { %915 = vmax.xlane.f32.xlu1 %v914_v50  ;;  %v908_v51 = vpop.f32.mrf.mxu0 }
 0x89e   :  { %v3007_v52 = vpop.f32.mrf.mxu0 }
 0x8ad   :  { %935 = vrot.lane.b32.xlu1 %v3492_v26, %s3380_s28 }
 0x8b1   :  { %1070 = vrot.lane.b32.xlu1 %v3436_v2, %s3381_s29 }
 0x8b5   :  { %3207 = vrot.lane.b32.xlu1 %v3206_v29, %s3382_s30 }
 0x921   :  { %v913_v53 = vpop.xlane.xlu0 %912 }
 0x922   :  { %v917_v54 = vsub.f32 %v856_v40, %v913_v53 }
 0x924   :  { %v919_v55 = vmul.f32 1.442695, %v917_v54 }
 0x925   :  { %v916_v56 = vpop.xlane.xlu1 %915 }
 0x926   :  { %3278 = vpow2.f32 %v919_v55  ;;  %v918_v57 = vsub.f32 %v906_v47, %v916_v56 }
 0x928   :  { %v921_v58 = vmul.f32 1.442695, %v918_v57 }
 0x929   :  { %v936_v59 = vpop.permute.xlu1 %935 }
 0x92a   :  { %3280 = vpow2.f32 %v921_v58  ;;  %v941_v26 = vsel %vm279_vm3, %v936_v59, 0 }
 0x92b   :  { %3009 = vmatpush3.bf16.msra.mxu1 %v941_v26 }
 0x92c   :  { %3020 = vmatprep.subr.bf16.mxu1 %v3368_v1 }
 0x92d   :  { %v1071_v8 = vpop.permute.xlu1 %1070 }
 0x931   :  { %v3208_v32 = vpop.permute.xlu1 %3207 }
 0x932   :  { %v3210_v33 = vunpack.i.h.bf16 %v3208_v32 }
 0x933   :  { %v3279_v2 = vpop.eup %3278 }
 0x934   :  { %v923_v60 = vsel %vm154_vm2, %v3279_v2, 0.0  ;;  %v1056_v39 = vsel %vm154_vm2, %v3558_v31, %v3210_v33  ;;  %v1066_v31 = vsub.s32 3, %v3439_v3  ;;  %v3242_v33 = vld [vmem:[%s4068_s5 + $0x28] sm:$0xff]  }
 0x935   :  { %924 = vadd.xlane.f32.xlu0 %v923_v60 }
 0x937   :  { %v3281_v23 = vpop.eup %3280 }
 0x938   :  { %v926_v28 = vsel %vm154_vm2, %v3281_v23, 0.0 }
 0x939   :  { %927 = vadd.xlane.f32.xlu0 %v926_v28 }
 0x94f   :  { %983 = vrot.lane.b32.xlu0 %v3496_v30, %s3380_s28 }
 0x953   :  { %3212 = vrot.lane.b32.xlu0 %v3211_v34, %s3383_s9  ;;  %v3209_v34 = vunpack.i.l.bf16 %v3208_v32 }
 0x955   :  { %v1055_v40 = vsel %vm154_vm2, %v3556_v27, %v3209_v34  ;;  %v1067_v27 = vrot.slane %v3487_v21, %v1066_v31  ;;  %v3243_v34 = vld [vmem:[%s4068_s5 + $0x20] sm:$0xff]  }
 0x957   :  { %1068 = vrot.lane.b32.xlu0 %v3452_v6, %s3381_s29 }
 0x9be   :  { %v925_v29 = vpop.xlane.xlu0 %924 }
 0x9bf   :  { %3282 = vrcp.f32 %v925_v29 }
 0x9c2   :  { %v928_v61 = vpop.xlane.xlu0 %927 }
 0x9c3   :  { %3284 = vrcp.f32 %v928_v61 }
 0x9c6   :  { %v984_v62 = vpop.permute.xlu0 %983 }
 0x9c7   :  { %v989_v63 = vsel %vm279_vm3, %v984_v62, 0  ;;  %v3240_v62 = vld [vmem:[%s4068_s5 + $0x8] sm:$0xff]  }
 0x9c8   :  { %3015 = vmatpush3.bf16.msra.mxu0 %v989_v63  ;;  %v3241_v63 = vld [vmem:[%s4068_s5] sm:$0xff]  }
 0x9c9   :  { %3028 = vmatprep.subr.bf16.mxu0 %v3368_v1 }
 0x9ca   :  { %v3213_v10 = vpop.permute.xlu0 %3212 }
 0x9cb   :  { %v3215_v35 = vunpack.i.h.bf16 %v3213_v10  ;;  %v3214_v36 = vunpack.i.l.bf16 %v3213_v10 }
 0x9cc   :  { %v3283_v0 = vpop.eup %3282 }
 0x9cd   :  { %v931_v4 = vmul.f32 %v3283_v0, %v3279_v2  ;;  %v1059_v44 = vsel %vm1057_vm4, %v1056_v39, %v3215_v35  ;;  %v1058_v45 = vsel %vm1057_vm4, %v1055_v40, %v3214_v36  ;;  %v3244_v35 = vld [vmem:[%s4068_s5 + $0x18] sm:$0xff]   ;;  %v3245_v36 = vld [vmem:[%s4068_s5 + $0x10] sm:$0xff]  }
 0x9ce   :  { %v1069_v11 = vpop.permute.xlu0 %1068 }
 0x9cf   :  { %v933_v7 = vpack.c.bf16 %v931_v4, %v931_v4 }
 0x9d0   :  { %v3285_v30 = vpop.eup %3284 }
 0x9d1   :  { %3011 = vmatmul.mubr.msk.bf16.vlgmr.msra.gmra.mxu1 %vm154_vm2, %v933_v7  ;;  %v932_v9 = vmul.f32 %v3285_v30, %v3281_v23 }
 0x9d2   :  { %3021 = vmatpush3.bf16.msra.mxu1 %v1071_v8  ;;  %3024 = vmatprep.mubr.msk.bf16.mxu1 %vm3369_vm0, %v3368_v1 }
 0x9d3   :  { %v934_v6 = vpack.c.bf16 %v932_v9, %v932_v9  ;;  %3022 = vmatprep.subr.bf16.mxu1 %v3368_v1 }
 0x9d5   :  { %3017 = vmatmul.mubr.msk.bf16.vlgmr.msra.gmra.mxu0 %vm154_vm2, %v934_v6  ;;  %v1149_v6 = vsub.s32 4, %v3439_v3 }
 0x9d6   :  { %3032 = vmatprep.mubr.msk.bf16.mxu0 %vm3369_vm0, %v3368_v1  ;;  %3023 = vmatpush3.bf16.msra.mxu1 %v1069_v11 }
 0x9d7   :  { %3036 = vmatprep.subr.bf16.mxu1 %v3368_v1  ;;  %3029 = vmatpush3.bf16.msra.mxu0 %v3240_v62 }
 0x9d8   :  { %3030 = vmatprep.subr.bf16.mxu0 %v3368_v1 }
 0x9db   :  { %3031 = vmatpush3.bf16.msra.mxu0 %v3241_v63 }
 0x9dc   :  { %3048 = vmatprep.subr.bf16.mxu0 %v3368_v1 }
 0xa91   :  { %v977_v12 = vpop.f32.mrf.mxu1 }
 0xa93   :  { %v3012_v13 = vpop.f32.mrf.mxu1 }
 0xa94   :  { %v1155_v13 = vsub.s32 5, %v3439_v3 }
 0xa95   :  { %v980_v14 = vpop.f32.mrf.mxu1  ;;  %v1025_v15 = vpop.f32.mrf.mxu0 }
 0xa96   :  { %v3216_v16 = vpack.i.bf16 %v1025_v15, %v977_v12  ;;  %v1150_v12 = vrot.slane %v3487_v21, %v1149_v6 }
 0xa97   :  { %v3013_v19 = vpop.f32.mrf.mxu1  ;;  %v3018_v22 = vpop.f32.mrf.mxu0 }
 0xa98   :  { %3217 = vrot.lane.b32.xlu1 %v3216_v16, %s3384_s10  ;;  %v1156_v19 = vrot.slane %v3487_v21, %v1155_v13 }
 0xa99   :  { %v1028_v24 = vpop.f32.mrf.mxu0 }
 0xa9b   :  { %v3019_v25 = vpop.f32.mrf.mxu0 }
 0xb0a   :  { %v3218_v37 = vpop.permute.xlu1 %3217 }
 0xb0b   :  { %v3220_v42 = vunpack.i.h.bf16 %v3218_v37  ;;  %v3219_v43 = vunpack.i.l.bf16 %v3218_v37  ;;  %v1162_v37 = vsub.s32 6, %v3439_v3 }
 0xb0d   :  { %v1062_v46 = vsel %vm1060_vm5, %v1059_v44, %v3220_v42  ;;  %v1061_v47 = vsel %vm1060_vm5, %v1058_v45, %v3219_v43  ;;  %v1163_v39 = vrot.slane %v3487_v21, %v1162_v37 }
 0xb0e   :  { %v1063_v48 = vpack.c.bf16 %v1062_v46, %v1061_v47 }
 0xb10   :  { %3025 = vmatmul.mubr.msk.bf16.vlgmr.msra.gmra.mxu1 %vm92_vm1, %v1063_v48 }
 0xb11   :  { %3044 = vmatprep.mubr.msk.bf16.mxu1 %vm3369_vm0, %v3368_v1  ;;  %3037 = vmatpush3.bf16.msra.mxu1 %v3242_v33 }
 0xb12   :  { %3038 = vmatprep.subr.bf16.mxu1 %v3368_v1 }
 0xb15   :  { %3039 = vmatpush3.bf16.msra.mxu1 %v3243_v34 }
 0xb16   :  { %3040 = vmatprep.subr.bf16.mxu1 %v3368_v1 }
 0xb19   :  { %3041 = vmatpush3.bf16.msra.mxu1 %v3244_v35 }
 0xb1a   :  { %3042 = vmatprep.subr.bf16.mxu1 %v3368_v1 }
 0xb1d   :  { %3043 = vmatpush3.bf16.msra.mxu1 %v3245_v36 }
 0xb1e   :  { %3062 = vmatprep.subr.bf16.mxu1 %v3368_v1 }
 0xbd0   :  { %v1111_v49 = vpop.f32.mrf.mxu1 }
 0xbd1   :  { %v1112_v50 = vadd.f32 %v1111_v49, %v1067_v27 }
 0xbd2   :  { %v3026_v51 = vpop.f32.mrf.mxu1 }
 0xbd3   :  { %v3690_v52 = vadd.f32 %v1112_v50, %v3474_v17 }
 0xbd4   :  { %v1114_v53 = vpop.f32.mrf.mxu1 }
 0xbd5   :  { %v1115_v54 = vadd.f32 %v1114_v53, %v1067_v27  ;;  %v1120_v55 = vsel %vm92_vm1, %v3690_v52, 0.0 }
 0xbd6   :  { %1121 = vadd.xlane.f32.xlu1 %v1120_v55  ;;  %v3027_v56 = vpop.f32.mrf.mxu1 }
 0xbd7   :  { %v3695_v57 = vadd.f32 %v1115_v54, %v3476_v18 }
 0xbd9   :  { %v1123_v58 = vsel %vm92_vm1, %v3695_v57, 0.0 }
 0xbda   :  { %1124 = vadd.xlane.f32.xlu0 %v1123_v58 }
 0xc5f   :  { %v1122_v59 = vpop.xlane.xlu1 %1121 }
 0xc60   :  { %v1127_v26 = vmul.f32 0.03125, %v1122_v59 }
 0xc62   :  { %v1129_v2 = vsub.f32 %v3690_v52, %v1127_v26 }
 0xc63   :  { %v1125_v17 = vpop.xlane.xlu0 %1124 }
 0xc64   :  { %v1128_v60 = vmul.f32 0.03125, %v1125_v17  ;;  %v1131_v23 = vmul.f32 %v1129_v2, %v1129_v2 }
 0xc66   :  { %v1130_v28 = vsub.f32 %v3695_v57, %v1128_v60  ;;  %v1133_v29 = vsel %vm92_vm1, %v1131_v23, 0.0 }
 0xc67   :  { %1134 = vadd.xlane.f32.xlu0 %v1133_v29 }
 0xc68   :  { %v1132_v61 = vmul.f32 %v1130_v28, %v1130_v28 }
 0xc6a   :  { %v1136_v18 = vsel %vm92_vm1, %v1132_v61, 0.0  ;;  %v1241_v61 = vsub.s32 7, %v3439_v3 }
 0xc6b   :  { %1137 = vadd.xlane.f32.xlu1 %v1136_v18 }
 0xc6c   :  { %v1242_v18 = vrot.slane %v3487_v21, %v1241_v61 }
 0xcf0   :  { %v1135_v0 = vpop.xlane.xlu0 %1134 }
 0xcf1   :  { %v1139_v4 = vmul.f32 0.03125, %v1135_v0 }
 0xcf3   :  { %v1141_v7 = vadd.f32 1e-06, %v1139_v4 }
 0xcf4   :  { %v1138_v30 = vpop.xlane.xlu1 %1137 }
 0xcf5   :  { %3286 = vrsqrt.f32 %v1141_v7  ;;  %v1140_v8 = vmul.f32 0.03125, %v1138_v30 }
 0xcf7   :  { %v1142_v9 = vadd.f32 1e-06, %v1140_v8 }
 0xcf9   :  { %3288 = vrsqrt.f32 %v1142_v9 }
 0xd02   :  { %v3287_v10 = vpop.eup %3286 }
 0xd03   :  { %v1145_v11 = vmul.f32 %v3287_v10, %v1129_v2 }
 0xd05   :  { %v1151_v16 = vmul.f32 %v1150_v12, %v1145_v11 }
 0xd06   :  { %v3289_v14 = vpop.eup %3288 }
 0xd07   :  { %v1146_v15 = vmul.f32 %v3289_v14, %v1130_v28  ;;  %v1157_v24 = vadd.f32 %v1156_v19, %v1151_v16 }
 0xd09   :  { %v1152_v22 = vmul.f32 %v1150_v12, %v1146_v15 }
 0xd0b   :  { %v1158_v25 = vadd.f32 %v1156_v19, %v1152_v22 }
 0xd0d   :  { %v1159_v32 = vpack.c.bf16 %v1158_v25, %v1157_v24  ;;  %v3766_v25 = vld [vmem:[%s4067_s4 + $0x18] sm:$0xff]  }
 0xd0f   :  { %3033 = vmatmul.mubr.msk.bf16.vlgmr.msra.gmra.mxu0 %vm92_vm1, %v1159_v32  ;;  %v3772_v32 = vld [vmem:[%s4067_s4 + $0x10] sm:$0xff]  }
 0xd10   :  { %3052 = vmatprep.mubr.msk.bf16.mxu0 %vm3369_vm0, %v3368_v1  ;;  %3049 = vmatpush3.bf16.msra.mxu0 %v3766_v25 }
 0xd11   :  { %3050 = vmatprep.subr.bf16.mxu0 %v3368_v1 }
 0xd14   :  { %3051 = vmatpush3.bf16.msra.mxu0 %v3772_v32 }
 0xd15   :  { %3056 = vmatprep.subr.bf16.mxu0 %v3368_v1 }
 0xdcf   :  { %v1213_v40 = vpop.f32.mrf.mxu0 }
 0xdd0   :  { %v1214_v42 = vadd.f32 %v1213_v40, %v1163_v39 }
 0xdd1   :  { %v3034_v43 = vpop.f32.mrf.mxu0 }
 0xdd2   :  { %v1222_v44 = vmul.f32 %v1214_v42, %v1214_v42  ;;  %v1220_v2 = vmul.f32 0.5, %v1214_v42 }
 0xdd3   :  { %v1216_v45 = vpop.f32.mrf.mxu0 }
 0xdd4   :  { %v1224_v46 = vmul.f32 %v1222_v44, %v1214_v42  ;;  %v1217_v47 = vadd.f32 %v1216_v45, %v1163_v39 }
 0xdd5   :  { %v3035_v48 = vpop.f32.mrf.mxu0 }
 0xdd6   :  { %v1226_v27 = vmul.f32 0.044715, %v1224_v46  ;;  %v1223_v49 = vmul.f32 %v1217_v47, %v1217_v47  ;;  %v1221_v17 = vmul.f32 0.5, %v1217_v47  ;;  %v1368_v46 = vsub.s32 1, %v3439_v3 }
 0xdd8   :  { %v1228_v50 = vadd.f32 %v1226_v27, %v1214_v42  ;;  %v1225_v51 = vmul.f32 %v1223_v49, %v1217_v47  ;;  %v3780_v42 = vld [vmem:[%s4069_s6 + $0x8] sm:$0xff] }
 0xdd9   :  { %v1363_v45 = vrot.slane %v3780_v42, %v3446_v5  ;;  %v1369_v49 = vrot.slane %v3780_v42, %v1368_v46  ;;  %v1376_v5 = vrot.slane %v3780_v42, %v78_v20 }
 0xdda   :  { %v1230_v53 = vmul.f32 0.7978846, %v1228_v50  ;;  %v1227_v54 = vmul.f32 0.044715, %v1225_v51 }
 0xddc   :  { %3290 = vtanh.f32 %v1230_v53  ;;  %v1229_v55 = vadd.f32 %v1227_v54, %v1217_v47 }
 0xdde   :  { %v1231_v56 = vmul.f32 0.7978846, %v1229_v55 }
 0xde0   :  { %3292 = vtanh.f32 %v1231_v56 }
 0xde9   :  { %v3291_v58 = vpop.eup %3290 }
 0xdea   :  { %v1234_v59 = vadd.f32 1.0, %v3291_v58 }
 0xdec   :  { %v1236_v23 = vmul.f32 %v1234_v59, %v1220_v2 }
 0xded   :  { %v3293_v26 = vpop.eup %3292 }
 0xdee   :  { %v1235_v60 = vadd.f32 1.0, %v3293_v26 }
 0xdf0   :  { %v1237_v28 = vmul.f32 %v1235_v60, %v1221_v17 }
 0xdf2   :  { %v1238_v29 = vpack.c.bf16 %v1237_v28, %v1236_v23 }
 0xdf4   :  { %3045 = vmatmul.mubr.msk.bf16.vlgmr.msra.gmra.mxu1 %vm1267_vm6, %v1238_v29 }
 0xdf5   :  { %3064 = vmatprep.mubr.msk.bf16.mxu1 %vm3369_vm0, %v3368_v1 }
 0xeb4   :  { %v1305_v62 = vpop.f32.mrf.mxu1 }
 0xeb5   :  { %v1306_v63 = vadd.f32 %v1305_v62, %v1242_v18 }
 0xeb6   :  { %v3046_v0 = vpop.f32.mrf.mxu1 }
 0xeb7   :  { %v3750_v4 = vadd.f32 %v1306_v63, %v3690_v52 }
 0xeb8   :  { %v1308_v7 = vpop.f32.mrf.mxu1 }
 0xeb9   :  { %v1309_v30 = vadd.f32 %v1308_v7, %v1242_v18  ;;  %v1334_v8 = vsel %vm92_vm1, %v3750_v4, 0.0 }
 0xeba   :  { %1335 = vadd.xlane.f32.xlu0 %v1334_v8  ;;  %v3047_v9 = vpop.f32.mrf.mxu1 }
 0xebb   :  { %v3755_v10 = vadd.f32 %v1309_v30, %v3695_v57 }
 0xebd   :  { %v1337_v11 = vsel %vm92_vm1, %v3755_v10, 0.0 }
 0xebe   :  { %1338 = vadd.xlane.f32.xlu1 %v1337_v11 }
 0xf43   :  { %v1336_v21 = vpop.xlane.xlu0 %1335 }
 0xf44   :  { %v1340_v12 = vmul.f32 0.03125, %v1336_v21 }
 0xf46   :  { %v1342_v14 = vsub.f32 %v3750_v4, %v1340_v12 }
 0xf47   :  { %v1339_v52 = vpop.xlane.xlu1 %1338 }
 0xf48   :  { %v1341_v15 = vmul.f32 0.03125, %v1339_v52  ;;  %v1344_v16 = vmul.f32 %v1342_v14, %v1342_v14 }
 0xf4a   :  { %v1343_v19 = vsub.f32 %v3755_v10, %v1341_v15  ;;  %v1346_v22 = vsel %vm92_vm1, %v1344_v16, 0.0 }
 0xf4b   :  { %1347 = vadd.xlane.f32.xlu0 %v1346_v22 }
 0xf4c   :  { %v1345_v24 = vmul.f32 %v1343_v19, %v1343_v19 }
 0xf4e   :  { %v1349_v57 = vsel %vm92_vm1, %v1345_v24, 0.0 }
 0xf4f   :  { %1350 = vadd.xlane.f32.xlu1 %v1349_v57 }
 0xfd4   :  { %v1348_v33 = vpop.xlane.xlu0 %1347 }
 0xfd5   :  { %v1352_v34 = vmul.f32 0.03125, %v1348_v33 }
 0xfd7   :  { %v1354_v35 = vadd.f32 1e-06, %v1352_v34 }
 0xfd8   :  { %v1351_v36 = vpop.xlane.xlu1 %1350 }
 0xfd9   :  { %3294 = vrsqrt.f32 %v1354_v35  ;;  %v1353_v39 = vmul.f32 0.03125, %v1351_v36 }
 0xfdb   :  { %v1355_v40 = vadd.f32 1e-06, %v1353_v39 }
 0xfdd   :  { %3296 = vrsqrt.f32 %v1355_v40 }
 0xfe6   :  { %v3295_v43 = vpop.eup %3294 }
 0xfe7   :  { %v1358_v44 = vmul.f32 %v3295_v43, %v1342_v14 }
 0xfe9   :  { %v1364_v27 = vmul.f32 %v1363_v45, %v1358_v44 }
 0xfea   :  { %v3297_v47 = vpop.eup %3296 }
 0xfeb   :  { %v1359_v48 = vmul.f32 %v3297_v47, %v1343_v19  ;;  %v1370_v51 = vadd.f32 %v1369_v49, %v1364_v27 }
 0xfed   :  { %v1365_v50 = vmul.f32 %v1363_v45, %v1359_v48 }
 0xfef   :  { %v1371_v53 = vadd.f32 %v1369_v49, %v1365_v50 }
 0xff1   :  { %v1372_v54 = vpack.c.bf16 %v1371_v53, %v1370_v51 }
 0xff3   :  { %3053 = vmatmul.mubr.msk.bf16.vlgmr.msra.gmra.mxu0 %vm92_vm1, %v1372_v54 }
 0xff4   :  { %3058 = vmatprep.mubr.msk.bf16.mxu0 %vm3369_vm0, %v3368_v1 }
0x10b3   :  { %v1426_v55 = vpop.f32.mrf.mxu0 }
0x10b4   :  { %v1427_v56 = vadd.f32 %v1426_v55, %v1376_v5 }
0x10b5   :  { %v3054_v58 = vpop.f32.mrf.mxu0 }
0x10b6   :  { %v3792_v59 = vpack.c.bf16 %v1427_v56, %v1427_v56 }
0x10b7   :  { %v1429_v26 = vpop.f32.mrf.mxu0 }
0x10b8   :  { %v1430_v2 = vadd.f32 %v1429_v26, %v1376_v5  ;;  %1436 = vrot.lane.b32.xlu0 %v3792_v59, %s3370_s3 }
0x10b9   :  { %v3055_v17 = vpop.f32.mrf.mxu0 }
0x10ba   :  { %v3796_v60 = vpack.c.bf16 %v1430_v2, %v1430_v2 }
0x10bc   :  { %1485 = vrot.lane.b32.xlu1 %v3796_v60, %s3370_s3 }
0x112a   :  { %v1437_v23 = vpop.permute.xlu0 %1436 }
0x112b   :  { %v1442_v28 = vsel %vm154_vm2, %v1437_v23, 0 }
0x112c   :  { %3057 = vmatpush3.bf16.xpose.msra.mxu0 %v1442_v28 }
0x112d   :  { %3068 = vmatprep.subr.bf16.mxu0 %v3368_v1 }
0x112e   :  { %v1486_v20 = vpop.permute.xlu1 %1485 }
0x112f   :  { %v1491_v29 = vsel %vm154_vm2, %v1486_v20, 0 }
0x1130   :  { %3063 = vmatpush3.bf16.xpose.msra.mxu1 %v1491_v29 }
0x1131   :  { %3074 = vmatprep.subr.bf16.mxu1 %v3368_v1 }
0x1133   :  { %3059 = vmatmul.mubr.msk.bf16.vlgmr.msra.gmra.mxu0 %vm154_vm2, %v3792_v59 }
0x1134   :  { %3070 = vmatprep.mubr.msk.bf16.mxu0 %vm3369_vm0, %v3368_v1 }
0x1137   :  { %3065 = vmatmul.mubr.msk.bf16.vlgmr.msra.gmra.mxu1 %vm154_vm2, %v3796_v60 }
0x1138   :  { %3076 = vmatprep.mubr.msk.bf16.mxu1 %vm3369_vm0, %v3368_v1 }
0x11f3   :  { %v1478_v18 = vpop.f32.mrf.mxu0 }
0x11f4   :  { %v1479_v62 = vadd.f32 %v1478_v18, %v3513_v38 }
0x11f5   :  { %v3060_v63 = vpop.f32.mrf.mxu0 }
0x11f6   :  { %v1533_v0 = vsel %vm154_vm2, %v1479_v62, -inf }
0x11f7   :  { %1534 = vmax.xlane.f32.xlu1 %v1533_v0  ;;  %v1481_v7 = vpop.f32.mrf.mxu0  ;;  %v1527_v30 = vpop.f32.mrf.mxu1 }
0x11f8   :  { %v1528_v8 = vadd.f32 %v1527_v30, %v3516_v41 }
0x11f9   :  { %v3061_v9 = vpop.f32.mrf.mxu0  ;;  %v3066_v11 = vpop.f32.mrf.mxu1 }
0x11fa   :  { %v1536_v21 = vsel %vm154_vm2, %v1528_v8, -inf }
0x11fb   :  { %1537 = vmax.xlane.f32.xlu0 %v1536_v21  ;;  %v1530_v12 = vpop.f32.mrf.mxu1 }
0x11fd   :  { %v3067_v14 = vpop.f32.mrf.mxu1 }
0x1208   :  { %1605 = vrot.lane.b32.xlu1 %v3796_v60, %s3371_s19 }
0x1211   :  { %1557 = vrot.lane.b32.xlu0 %v3792_v59, %s3371_s19 }
0x1280   :  { %v1535_v52 = vpop.xlane.xlu1 %1534 }
0x1281   :  { %v1539_v15 = vsub.f32 %v1479_v62, %v1535_v52 }
0x1283   :  { %v1541_v16 = vmul.f32 1.442695, %v1539_v15 }
0x1284   :  { %v1606_v19 = vpop.permute.xlu1 %1605  ;;  %v1538_v22 = vpop.xlane.xlu0 %1537 }
0x1285   :  { %3298 = vpow2.f32 %v1541_v16  ;;  %v1611_v24 = vsel %vm279_vm3, %v1606_v19, 0  ;;  %v1540_v57 = vsub.f32 %v1528_v8, %v1538_v22 }
0x1286   :  { %3075 = vmatpush3.bf16.msra.mxu1 %v1611_v24 }
0x1287   :  { %v1543_v33 = vmul.f32 1.442695, %v1540_v57  ;;  %3086 = vmatprep.subr.bf16.mxu1 %v3368_v1 }
0x1288   :  { %v1558_v34 = vpop.permute.xlu0 %1557 }
0x1289   :  { %3300 = vpow2.f32 %v1543_v33  ;;  %v1563_v35 = vsel %vm279_vm3, %v1558_v34, 0 }
0x128a   :  { %3069 = vmatpush3.bf16.msra.mxu0 %v1563_v35 }
0x128b   :  { %3080 = vmatprep.subr.bf16.mxu0 %v3368_v1 }
0x1292   :  { %v3299_v36 = vpop.eup %3298 }
0x1293   :  { %v1545_v39 = vsel %vm154_vm2, %v3299_v36, 0.0 }
0x1294   :  { %1546 = vadd.xlane.f32.xlu0 %v1545_v39 }
0x1296   :  { %v3301_v40 = vpop.eup %3300 }
0x1297   :  { %v1548_v43 = vsel %vm154_vm2, %v3301_v40, 0.0 }
0x1298   :  { %1549 = vadd.xlane.f32.xlu1 %v1548_v43 }
0x12a9   :  { %1655 = vrot.lane.b32.xlu1 %v3792_v59, %s3372_s20 }
0x12aa   :  { %1705 = vrot.lane.b32.xlu0 %v3796_v60, %s3372_s20 }
0x12ad   :  { %1653 = vrot.lane.b32.xlu1 %v3792_v59, %s3373_s21 }
0x12ae   :  { %1703 = vrot.lane.b32.xlu0 %v3796_v60, %s3373_s21 }
0x131d   :  { %v1547_v44 = vpop.xlane.xlu0 %1546 }
0x131e   :  { %3302 = vrcp.f32 %v1547_v44 }
0x1321   :  { %v1550_v45 = vpop.xlane.xlu1 %1549  ;;  %v1706_v53 = vpop.permute.xlu0 %1705 }
0x1322   :  { %3304 = vrcp.f32 %v1550_v45  ;;  %v1711_v5 = vsel %vm154_vm2, %v1706_v53, 0 }
0x1325   :  { %v1656_v48 = vpop.permute.xlu1 %1655  ;;  %v1704_v56 = vpop.permute.xlu0 %1703 }
0x1326   :  { %v1661_v50 = vsel %vm154_vm2, %v1656_v48, 0 }
0x1329   :  { %v1654_v55 = vpop.permute.xlu1 %1653 }
0x132b   :  { %v3303_v46 = vpop.eup %3302 }
0x132c   :  { %v1553_v47 = vmul.f32 %v3303_v46, %v3299_v36 }
0x132e   :  { %v1555_v27 = vpack.c.bf16 %v1553_v47, %v1553_v47 }
0x132f   :  { %v3305_v49 = vpop.eup %3304 }
0x1330   :  { %3071 = vmatmul.mubr.msk.bf16.vlgmr.msra.gmra.mxu0 %vm154_vm2, %v1555_v27  ;;  %v1554_v51 = vmul.f32 %v3305_v49, %v3301_v40 }
0x1331   :  { %3081 = vmatpush3.bf16.xpose.msra.mxu0 %v1661_v50  ;;  %3082 = vmatprep.mubr.msk.bf16.mxu0 %vm3369_vm0, %v3368_v1 }
0x1332   :  { %v1556_v54 = vpack.c.bf16 %v1554_v51, %v1554_v51  ;;  %3092 = vmatprep.subr.bf16.mxu0 %v3368_v1 }
0x1334   :  { %3077 = vmatmul.mubr.msk.bf16.vlgmr.msra.gmra.mxu1 %vm154_vm2, %v1556_v54 }
0x1335   :  { %3087 = vmatpush3.bf16.xpose.msra.mxu1 %v1711_v5  ;;  %3088 = vmatprep.mubr.msk.bf16.mxu1 %vm3369_vm0, %v3368_v1 }
0x1336   :  { %3098 = vmatprep.subr.bf16.mxu1 %v3368_v1 }
0x1338   :  { %3083 = vmatmul.mubr.msk.bf16.vlgmr.msra.gmra.mxu0 %vm154_vm2, %v1654_v55 }
0x1339   :  { %3094 = vmatprep.mubr.msk.bf16.mxu0 %vm3369_vm0, %v3368_v1 }
0x133c   :  { %3089 = vmatmul.mubr.msk.bf16.vlgmr.msra.gmra.mxu1 %vm154_vm2, %v1704_v56 }
0x133d   :  { %3100 = vmatprep.mubr.msk.bf16.mxu1 %vm3369_vm0, %v3368_v1 }
0x13f0   :  { %v3850_v58 = vpop.f32.mrf.mxu0 }
0x13f2   :  { %v3072_v26 = vpop.f32.mrf.mxu0 }
0x13f4   :  { %v1602_v2 = vpop.f32.mrf.mxu0  ;;  %v3852_v17 = vpop.f32.mrf.mxu1 }
0x13f6   :  { %v3073_v23 = vpop.f32.mrf.mxu0  ;;  %v3078_v28 = vpop.f32.mrf.mxu1 }
0x13f8   :  { %v1650_v20 = vpop.f32.mrf.mxu1  ;;  %v1697_v29 = vpop.f32.mrf.mxu0 }
0x13f9   :  { %v1698_v18 = vadd.f32 %v1697_v29, %v3513_v38 }
0x13fa   :  { %v3079_v62 = vpop.f32.mrf.mxu1  ;;  %v3084_v63 = vpop.f32.mrf.mxu0 }
0x13fb   :  { %v1753_v0 = vsel %vm154_vm2, %v1698_v18, -inf }
0x13fc   :  { %1754 = vmax.xlane.f32.xlu1 %v1753_v0  ;;  %v1700_v7 = vpop.f32.mrf.mxu0  ;;  %v1747_v30 = vpop.f32.mrf.mxu1 }
0x13fd   :  { %v1748_v8 = vadd.f32 %v1747_v30, %v3516_v41 }
0x13fe   :  { %v3085_v9 = vpop.f32.mrf.mxu0  ;;  %v3090_v11 = vpop.f32.mrf.mxu1 }
0x13ff   :  { %v1756_v21 = vsel %vm154_vm2, %v1748_v8, -inf }
0x1400   :  { %1757 = vmax.xlane.f32.xlu0 %v1756_v21  ;;  %v1750_v12 = vpop.f32.mrf.mxu1 }
0x1402   :  { %v3091_v14 = vpop.f32.mrf.mxu1 }
0x140d   :  { %1825 = vrot.lane.b32.xlu1 %v3796_v60, %s3374_s22 }
0x1416   :  { %1777 = vrot.lane.b32.xlu0 %v3792_v59, %s3374_s22 }
0x1485   :  { %v1755_v52 = vpop.xlane.xlu1 %1754 }
0x1486   :  { %v1759_v15 = vsub.f32 %v1698_v18, %v1755_v52 }
0x1488   :  { %v1761_v16 = vmul.f32 1.442695, %v1759_v15 }
0x1489   :  { %v1826_v19 = vpop.permute.xlu1 %1825  ;;  %v1758_v22 = vpop.xlane.xlu0 %1757 }
0x148a   :  { %3306 = vpow2.f32 %v1761_v16  ;;  %v1831_v24 = vsel %vm279_vm3, %v1826_v19, 0  ;;  %v1760_v57 = vsub.f32 %v1748_v8, %v1758_v22 }
0x148b   :  { %3099 = vmatpush3.bf16.msra.mxu1 %v1831_v24 }
0x148c   :  { %v1763_v33 = vmul.f32 1.442695, %v1760_v57  ;;  %3110 = vmatprep.subr.bf16.mxu1 %v3368_v1 }
0x148d   :  { %v1778_v34 = vpop.permute.xlu0 %1777 }
0x148e   :  { %3308 = vpow2.f32 %v1763_v33  ;;  %v1783_v35 = vsel %vm279_vm3, %v1778_v34, 0 }
0x148f   :  { %3093 = vmatpush3.bf16.msra.mxu0 %v1783_v35 }
0x1490   :  { %3104 = vmatprep.subr.bf16.mxu0 %v3368_v1 }
0x1497   :  { %v3307_v36 = vpop.eup %3306 }
0x1498   :  { %v1765_v39 = vsel %vm154_vm2, %v3307_v36, 0.0 }
0x1499   :  { %1766 = vadd.xlane.f32.xlu0 %v1765_v39 }
0x149b   :  { %v3309_v40 = vpop.eup %3308 }
0x149c   :  { %v1768_v43 = vsel %vm154_vm2, %v3309_v40, 0.0 }
0x149d   :  { %1769 = vadd.xlane.f32.xlu1 %v1768_v43 }
0x14ae   :  { %1875 = vrot.lane.b32.xlu1 %v3792_v59, %s3375_s23 }
0x14af   :  { %1925 = vrot.lane.b32.xlu0 %v3796_v60, %s3375_s23 }
0x14b2   :  { %1873 = vrot.lane.b32.xlu1 %v3792_v59, %s3376_s24 }
0x14b3   :  { %1923 = vrot.lane.b32.xlu0 %v3796_v60, %s3376_s24 }
0x1522   :  { %v1767_v44 = vpop.xlane.xlu0 %1766 }
0x1523   :  { %3310 = vrcp.f32 %v1767_v44 }
0x1526   :  { %v1770_v45 = vpop.xlane.xlu1 %1769  ;;  %v1926_v53 = vpop.permute.xlu0 %1925 }
0x1527   :  { %3312 = vrcp.f32 %v1770_v45  ;;  %v1931_v5 = vsel %vm154_vm2, %v1926_v53, 0 }
0x152a   :  { %v1876_v48 = vpop.permute.xlu1 %1875  ;;  %v1924_v56 = vpop.permute.xlu0 %1923 }
0x152b   :  { %v1881_v50 = vsel %vm154_vm2, %v1876_v48, 0 }
0x152e   :  { %v1874_v55 = vpop.permute.xlu1 %1873 }
0x1530   :  { %v3311_v46 = vpop.eup %3310 }
0x1531   :  { %v1773_v47 = vmul.f32 %v3311_v46, %v3307_v36 }
0x1533   :  { %v1775_v27 = vpack.c.bf16 %v1773_v47, %v1773_v47 }
0x1534   :  { %v3313_v49 = vpop.eup %3312 }
0x1535   :  { %3095 = vmatmul.mubr.msk.bf16.vlgmr.msra.gmra.mxu0 %vm154_vm2, %v1775_v27  ;;  %v1774_v51 = vmul.f32 %v3313_v49, %v3309_v40 }
0x1536   :  { %3105 = vmatpush3.bf16.xpose.msra.mxu0 %v1881_v50  ;;  %3106 = vmatprep.mubr.msk.bf16.mxu0 %vm3369_vm0, %v3368_v1 }
0x1537   :  { %v1776_v54 = vpack.c.bf16 %v1774_v51, %v1774_v51  ;;  %3116 = vmatprep.subr.bf16.mxu0 %v3368_v1 }
0x1539   :  { %3101 = vmatmul.mubr.msk.bf16.vlgmr.msra.gmra.mxu1 %vm154_vm2, %v1776_v54 }
0x153a   :  { %3111 = vmatpush3.bf16.xpose.msra.mxu1 %v1931_v5  ;;  %3112 = vmatprep.mubr.msk.bf16.mxu1 %vm3369_vm0, %v3368_v1 }
0x153b   :  { %3122 = vmatprep.subr.bf16.mxu1 %v3368_v1 }
0x153d   :  { %3107 = vmatmul.mubr.msk.bf16.vlgmr.msra.gmra.mxu0 %vm154_vm2, %v1874_v55 }
0x153e   :  { %3118 = vmatprep.mubr.msk.bf16.mxu0 %vm3369_vm0, %v3368_v1 }
0x1541   :  { %3113 = vmatmul.mubr.msk.bf16.vlgmr.msra.gmra.mxu1 %vm154_vm2, %v1924_v56 }
0x1542   :  { %3124 = vmatprep.mubr.msk.bf16.mxu1 %vm3369_vm0, %v3368_v1 }
0x15f5   :  { %v3892_v26 = vpop.f32.mrf.mxu0 }
0x15f7   :  { %v3096_v2 = vpop.f32.mrf.mxu0 }
0x15f9   :  { %v1822_v23 = vpop.f32.mrf.mxu0  ;;  %v3894_v28 = vpop.f32.mrf.mxu1 }
0x15fa   :  { %v3221_v20 = vpack.i.bf16 %v3894_v28, %v3892_v26 }
0x15fb   :  { %v3097_v29 = vpop.f32.mrf.mxu0  ;;  %v3102_v18 = vpop.f32.mrf.mxu1 }
0x15fd   :  { %v1870_v62 = vpop.f32.mrf.mxu1  ;;  %v1917_v63 = vpop.f32.mrf.mxu0 }
0x15fe   :  { %v1918_v0 = vadd.f32 %v1917_v63, %v3513_v38 }
0x15ff   :  { %v3103_v7 = vpop.f32.mrf.mxu1  ;;  %v3108_v30 = vpop.f32.mrf.mxu0 }
0x1600   :  { %v1973_v8 = vsel %vm154_vm2, %v1918_v0, -inf }
0x1601   :  { %1974 = vmax.xlane.f32.xlu1 %v1973_v8  ;;  %v1920_v9 = vpop.f32.mrf.mxu0  ;;  %v1967_v11 = vpop.f32.mrf.mxu1 }
0x1602   :  { %v1968_v21 = vadd.f32 %v1967_v11, %v3516_v41 }
0x1603   :  { %v3109_v12 = vpop.f32.mrf.mxu0  ;;  %v3114_v14 = vpop.f32.mrf.mxu1 }
0x1604   :  { %v1976_v52 = vsel %vm154_vm2, %v1968_v21, -inf }
0x1605   :  { %1977 = vmax.xlane.f32.xlu0 %v1976_v52  ;;  %v1970_v15 = vpop.f32.mrf.mxu1 }
0x1607   :  { %v3115_v16 = vpop.f32.mrf.mxu1 }
0x1612   :  { %2045 = vrot.lane.b32.xlu1 %v3796_v60, %s3377_s25 }
0x161b   :  { %1997 = vrot.lane.b32.xlu0 %v3792_v59, %s3377_s25 }
0x168a   :  { %v1975_v19 = vpop.xlane.xlu1 %1974 }
0x168b   :  { %v1979_v22 = vsub.f32 %v1918_v0, %v1975_v19 }
0x168d   :  { %v1981_v24 = vmul.f32 1.442695, %v1979_v22 }
0x168e   :  { %v2046_v57 = vpop.permute.xlu1 %2045  ;;  %v1978_v33 = vpop.xlane.xlu0 %1977 }
0x168f   :  { %3314 = vpow2.f32 %v1981_v24  ;;  %v2051_v34 = vsel %vm279_vm3, %v2046_v57, 0  ;;  %v1980_v35 = vsub.f32 %v1968_v21, %v1978_v33 }
0x1690   :  { %3123 = vmatpush3.bf16.msra.mxu1 %v2051_v34 }
0x1691   :  { %v1983_v36 = vmul.f32 1.442695, %v1980_v35  ;;  %3134 = vmatprep.subr.bf16.mxu1 %v3368_v1 }
0x1692   :  { %v1998_v39 = vpop.permute.xlu0 %1997 }
0x1693   :  { %3316 = vpow2.f32 %v1983_v36  ;;  %v2003_v40 = vsel %vm279_vm3, %v1998_v39, 0 }
0x1694   :  { %3117 = vmatpush3.bf16.msra.mxu0 %v2003_v40 }
0x1695   :  { %3128 = vmatprep.subr.bf16.mxu0 %v3368_v1 }
0x169c   :  { %v3315_v43 = vpop.eup %3314 }
0x169d   :  { %v1985_v44 = vsel %vm154_vm2, %v3315_v43, 0.0 }
0x169e   :  { %1986 = vadd.xlane.f32.xlu0 %v1985_v44 }
0x16a0   :  { %v3317_v45 = vpop.eup %3316 }
0x16a1   :  { %v1988_v46 = vsel %vm154_vm2, %v3317_v45, 0.0 }
0x16a2   :  { %1989 = vadd.xlane.f32.xlu1 %v1988_v46 }
0x16b3   :  { %2095 = vrot.lane.b32.xlu1 %v3792_v59, %s3378_s26 }
0x16b4   :  { %2145 = vrot.lane.b32.xlu0 %v3796_v60, %s3378_s26 }
0x16b7   :  { %2093 = vrot.lane.b32.xlu1 %v3792_v59, %s3379_s27 }
0x16b8   :  { %2143 = vrot.lane.b32.xlu0 %v3796_v60, %s3379_s27 }
0x1727   :  { %v1987_v47 = vpop.xlane.xlu0 %1986 }
0x1728   :  { %3318 = vrcp.f32 %v1987_v47 }
0x172b   :  { %v1990_v48 = vpop.xlane.xlu1 %1989  ;;  %v2146_v55 = vpop.permute.xlu0 %2145 }
0x172c   :  { %3320 = vrcp.f32 %v1990_v48  ;;  %v2151_v2 = vsel %vm154_vm2, %v2146_v55, 0 }
0x172f   :  { %v2096_v50 = vpop.permute.xlu1 %2095  ;;  %v2144_v29 = vpop.permute.xlu0 %2143 }
0x1730   :  { %v2101_v54 = vsel %vm154_vm2, %v2096_v50, 0 }
0x1733   :  { %v2094_v23 = vpop.permute.xlu1 %2093 }
0x1735   :  { %v3319_v27 = vpop.eup %3318 }
0x1736   :  { %v1993_v49 = vmul.f32 %v3319_v27, %v3315_v43 }
0x1738   :  { %v1995_v51 = vpack.c.bf16 %v1993_v49, %v1993_v49 }
0x1739   :  { %v3321_v53 = vpop.eup %3320 }
0x173a   :  { %3119 = vmatmul.mubr.msk.bf16.vlgmr.msra.gmra.mxu0 %vm154_vm2, %v1995_v51  ;;  %v1994_v5 = vmul.f32 %v3321_v53, %v3317_v45 }
0x173b   :  { %3129 = vmatpush3.bf16.xpose.msra.mxu0 %v2101_v54  ;;  %3130 = vmatprep.mubr.msk.bf16.mxu0 %vm3369_vm0, %v3368_v1 }
0x173c   :  { %v1996_v56 = vpack.c.bf16 %v1994_v5, %v1994_v5  ;;  %3140 = vmatprep.subr.bf16.mxu0 %v3368_v1 }
0x173e   :  { %3125 = vmatmul.mubr.msk.bf16.vlgmr.msra.gmra.mxu1 %vm154_vm2, %v1996_v56 }
0x173f   :  { %3135 = vmatpush3.bf16.xpose.msra.mxu1 %v2151_v2  ;;  %3136 = vmatprep.mubr.msk.bf16.mxu1 %vm3369_vm0, %v3368_v1 }
0x1740   :  { %3146 = vmatprep.subr.bf16.mxu1 %v3368_v1 }
0x1742   :  { %3131 = vmatmul.mubr.msk.bf16.vlgmr.msra.gmra.mxu0 %vm154_vm2, %v2094_v23 }
0x1743   :  { %3142 = vmatprep.mubr.msk.bf16.mxu0 %vm3369_vm0, %v3368_v1 }
0x1746   :  { %3137 = vmatmul.mubr.msk.bf16.vlgmr.msra.gmra.mxu1 %vm154_vm2, %v2144_v29 }
0x1747   :  { %3148 = vmatprep.mubr.msk.bf16.mxu1 %vm3369_vm0, %v3368_v1 }
0x17fa   :  { %v2039_v18 = vpop.f32.mrf.mxu0 }
0x17fc   :  { %v3120_v62 = vpop.f32.mrf.mxu0 }
0x17fe   :  { %v2042_v63 = vpop.f32.mrf.mxu0  ;;  %v2087_v0 = vpop.f32.mrf.mxu1 }
0x17ff   :  { %v3226_v7 = vpack.i.bf16 %v2087_v0, %v2039_v18 }
0x1800   :  { %v3121_v30 = vpop.f32.mrf.mxu0  ;;  %v3126_v8 = vpop.f32.mrf.mxu1 }
0x1802   :  { %v2090_v9 = vpop.f32.mrf.mxu1  ;;  %v2137_v11 = vpop.f32.mrf.mxu0 }
0x1803   :  { %v2138_v21 = vadd.f32 %v2137_v11, %v3513_v38 }
0x1804   :  { %v3127_v12 = vpop.f32.mrf.mxu1  ;;  %v3132_v14 = vpop.f32.mrf.mxu0 }
0x1805   :  { %v2193_v52 = vsel %vm154_vm2, %v2138_v21, -inf }
0x1806   :  { %2194 = vmax.xlane.f32.xlu1 %v2193_v52  ;;  %v2140_v15 = vpop.f32.mrf.mxu0  ;;  %v2187_v16 = vpop.f32.mrf.mxu1 }
0x1807   :  { %v2188_v19 = vadd.f32 %v2187_v16, %v3516_v41 }
0x1808   :  { %v3133_v22 = vpop.f32.mrf.mxu0  ;;  %v3138_v24 = vpop.f32.mrf.mxu1 }
0x1809   :  { %v2196_v57 = vsel %vm154_vm2, %v2188_v19, -inf }
0x180a   :  { %2197 = vmax.xlane.f32.xlu0 %v2196_v57  ;;  %v2190_v33 = vpop.f32.mrf.mxu1 }
0x180c   :  { %v3139_v34 = vpop.f32.mrf.mxu1 }
0x188f   :  { %v2195_v35 = vpop.xlane.xlu1 %2194 }
0x1890   :  { %v2199_v36 = vsub.f32 %v2138_v21, %v2195_v35 }
0x1892   :  { %v2201_v39 = vmul.f32 1.442695, %v2199_v36 }
0x1893   :  { %v2198_v38 = vpop.xlane.xlu0 %2197 }
0x1894   :  { %3322 = vpow2.f32 %v2201_v39  ;;  %v2200_v40 = vsub.f32 %v2188_v19, %v2198_v38 }
0x1896   :  { %v2203_v43 = vmul.f32 1.442695, %v2200_v40 }
0x1898   :  { %3324 = vpow2.f32 %v2203_v43 }
0x18a1   :  { %v3323_v44 = vpop.eup %3322 }
0x18a2   :  { %v2205_v45 = vsel %vm154_vm2, %v3323_v44, 0.0 }
0x18a3   :  { %2206 = vadd.xlane.f32.xlu0 %v2205_v45 }
0x18a5   :  { %v3325_v41 = vpop.eup %3324 }
0x18a6   :  { %v2208_v46 = vsel %vm154_vm2, %v3325_v41, 0.0 }
0x18a7   :  { %2209 = vadd.xlane.f32.xlu1 %v2208_v46 }
0x18b8   :  { %2265 = vrot.lane.b32.xlu1 %v3796_v60, %s3380_s28 }
0x18b9   :  { %2217 = vrot.lane.b32.xlu0 %v3792_v59, %s3380_s28 }
0x18bc   :  { %2350 = vrot.lane.b32.xlu1 %v3766_v25, %s3381_s29 }
0x18bd   :  { %3222 = vrot.lane.b32.xlu0 %v3221_v20, %s3382_s30 }
0x18c0   :  { %3227 = vrot.lane.b32.xlu1 %v3226_v7, %s3383_s9 }
0x18c4   :  { %2348 = vrot.lane.b32.xlu1 %v3772_v32, %s3381_s29 }
0x192c   :  { %v2207_v47 = vpop.xlane.xlu0 %2206 }
0x192d   :  { %3326 = vrcp.f32 %v2207_v47 }
0x1930   :  { %v2210_v48 = vpop.xlane.xlu1 %2209  ;;  %v2218_v60 = vpop.permute.xlu0 %2217 }
0x1931   :  { %3328 = vrcp.f32 %v2210_v48  ;;  %v2223_v59 = vsel %vm279_vm3, %v2218_v60, 0 }
0x1932   :  { %3141 = vmatpush3.bf16.msra.mxu0 %v2223_v59  ;;  %v3248_v59 = vld [vmem:[%s4068_s5 + $0x38] sm:$0xff]  }
0x1933   :  { %3152 = vmatprep.subr.bf16.mxu0 %v3368_v1 }
0x1934   :  { %v2266_v25 = vpop.permute.xlu1 %2265  ;;  %v3223_v0 = vpop.permute.xlu0 %3222 }
0x1935   :  { %v2271_v27 = vsel %vm279_vm3, %v2266_v25, 0  ;;  %v3225_v7 = vunpack.i.h.bf16 %v3223_v0  ;;  %v3224_v30 = vunpack.i.l.bf16 %v3223_v0  ;;  %v3249_v25 = vld [vmem:[%s4068_s5 + $0x30] sm:$0xff]   ;;  %v2442_v0 = vrot.slane %v3780_v42, %v1162_v37 }
0x1936   :  { %3147 = vmatpush3.bf16.msra.mxu1 %v2271_v27 }
0x1937   :  { %3160 = vmatprep.subr.bf16.mxu1 %v3368_v1  ;;  %v2338_v21 = vsel %vm154_vm2, %v3852_v17, %v3225_v7  ;;  %v2337_v12 = vsel %vm154_vm2, %v3850_v58, %v3224_v30  ;;  %v2347_v58 = vrot.slane %v3780_v42, %v1066_v31 }
0x1938   :  { %v2351_v49 = vpop.permute.xlu1 %2350 }
0x193a   :  { %v3327_v26 = vpop.eup %3326 }
0x193b   :  { %v2213_v28 = vmul.f32 %v3327_v26, %v3323_v44 }
0x193c   :  { %v3228_v53 = vpop.permute.xlu1 %3227 }
0x193d   :  { %v2215_v20 = vpack.c.bf16 %v2213_v28, %v2213_v28  ;;  %v3230_v8 = vunpack.i.h.bf16 %v3228_v53  ;;  %v3229_v9 = vunpack.i.l.bf16 %v3228_v53  ;;  %v2429_v53 = vrot.slane %v3780_v42, %v1149_v6  ;;  %v3250_v6 = vld [vmem:[%s4068_s5 + $0x58] sm:$0xff]  }
0x193e   :  { %v3329_v32 = vpop.eup %3328 }
0x193f   :  { %3143 = vmatmul.mubr.msk.bf16.vlgmr.msra.gmra.mxu0 %vm154_vm2, %v2215_v20  ;;  %v2214_v50 = vmul.f32 %v3329_v32, %v3325_v41  ;;  %v2339_v15 = vsel %vm1057_vm4, %v2337_v12, %v3229_v9  ;;  %v2340_v16 = vsel %vm1057_vm4, %v2338_v21, %v3230_v8 }
0x1940   :  { %3153 = vmatpush3.bf16.msra.mxu0 %v2351_v49  ;;  %3156 = vmatprep.mubr.msk.bf16.mxu0 %vm3369_vm0, %v3368_v1  ;;  %v2349_v54 = vpop.permute.xlu1 %2348 }
0x1941   :  { %v2216_v51 = vpack.c.bf16 %v2214_v50, %v2214_v50  ;;  %3154 = vmatprep.subr.bf16.mxu0 %v3368_v1 }
0x1943   :  { %3149 = vmatmul.mubr.msk.bf16.vlgmr.msra.gmra.mxu1 %vm154_vm2, %v2216_v51 }
0x1944   :  { %3164 = vmatprep.mubr.msk.bf16.mxu1 %vm3369_vm0, %v3368_v1  ;;  %3155 = vmatpush3.bf16.msra.mxu0 %v2349_v54 }
0x1945   :  { %3168 = vmatprep.subr.bf16.mxu0 %v3368_v1  ;;  %3161 = vmatpush3.bf16.msra.mxu1 %v3248_v59 }
0x1946   :  { %3162 = vmatprep.subr.bf16.mxu1 %v3368_v1 }
0x1949   :  { %3163 = vmatpush3.bf16.msra.mxu1 %v3249_v25 }
0x194a   :  { %3180 = vmatprep.subr.mxu1 %v3368_v1 }
0x19ff   :  { %v2259_v5 = vpop.f32.mrf.mxu0 }
0x1a01   :  { %v3144_v55 = vpop.f32.mrf.mxu0 }
0x1a03   :  { %v2262_v56 = vpop.f32.mrf.mxu0  ;;  %v2307_v2 = vpop.f32.mrf.mxu1 }
0x1a04   :  { %v3231_v23 = vpack.i.bf16 %v2307_v2, %v2259_v5  ;;  %v2435_v56 = vrot.slane %v3780_v42, %v1155_v13  ;;  %v3251_v13 = vld [vmem:[%s4068_s5 + $0x50] sm:$0xff]  }
0x1a05   :  { %v3145_v29 = vpop.f32.mrf.mxu0  ;;  %v3150_v18 = vpop.f32.mrf.mxu1 }
0x1a06   :  { %3232 = vrot.lane.b32.xlu0 %v3231_v23, %s3384_s10 }
0x1a07   :  { %v2310_v62 = vpop.f32.mrf.mxu1 }
0x1a08   :  { %v3252_v62 = vld [vmem:[%s4068_s5 + $0x48] sm:$0xff]  }
0x1a09   :  { %v3151_v63 = vpop.f32.mrf.mxu1 }
0x1a0a   :  { %v3253_v63 = vld [vmem:[%s4068_s5 + $0x40] sm:$0xff]  }
0x1a78   :  { %v3233_v11 = vpop.permute.xlu0 %3232 }
0x1a79   :  { %v3235_v14 = vunpack.i.h.bf16 %v3233_v11  ;;  %v3234_v52 = vunpack.i.l.bf16 %v3233_v11 }
0x1a7b   :  { %v2342_v19 = vsel %vm1060_vm5, %v2340_v16, %v3235_v14  ;;  %v2341_v22 = vsel %vm1060_vm5, %v2339_v15, %v3234_v52 }
0x1a7c   :  { %v2343_v24 = vpack.c.bf16 %v2342_v19, %v2341_v22 }
0x1a7e   :  { %3157 = vmatmul.mubr.msk.bf16.vlgmr.msra.gmra.mxu0 %vm92_vm1, %v2343_v24 }
0x1a7f   :  { %3176 = vmatprep.mubr.msk.bf16.mxu0 %vm3369_vm0, %v3368_v1  ;;  %3169 = vmatpush3.bf16.msra.mxu0 %v3250_v6  ;;  %v2816_v6 = vld [vmem:[%s4070_s7] ss:$0 sm:$0xff] }
0x1a80   :  { %3170 = vmatprep.subr.bf16.mxu0 %v3368_v1 }
0x1a83   :  { %3171 = vmatpush3.bf16.msra.mxu0 %v3251_v13 }
0x1a84   :  { %3172 = vmatprep.subr.bf16.mxu0 %v3368_v1 }
0x1a87   :  { %3173 = vmatpush3.bf16.msra.mxu0 %v3252_v62  ;;  %v2817_v62 = vld [vmem:[%s4070_s7 + $0x1] ss:$0 sm:$0xff] }
0x1a88   :  { %3174 = vmatprep.subr.bf16.mxu0 %v3368_v1 }
0x1a8b   :  { %3175 = vmatpush3.bf16.msra.mxu0 %v3253_v63 }
0x1b3e   :  { %v2391_v17 = vpop.f32.mrf.mxu0 }
0x1b3f   :  { %v2392_v57 = vadd.f32 %v2391_v17, %v2347_v58 }
0x1b40   :  { %v3158_v33 = vpop.f32.mrf.mxu0 }
0x1b41   :  { %v3983_v34 = vadd.f32 %v2392_v57, %v3750_v4 }
0x1b42   :  { %v2394_v35 = vpop.f32.mrf.mxu0 }
0x1b43   :  { %v2395_v36 = vadd.f32 %v2394_v35, %v2347_v58  ;;  %v2400_v39 = vsel %vm92_vm1, %v3983_v34, 0.0 }
0x1b44   :  { %2401 = vadd.xlane.f32.xlu0 %v2400_v39  ;;  %v3159_v38 = vpop.f32.mrf.mxu0 }
0x1b45   :  { %v3988_v40 = vadd.f32 %v2395_v36, %v3755_v10 }
0x1b47   :  { %v2403_v43 = vsel %vm92_vm1, %v3988_v40, 0.0 }
0x1b48   :  { %2404 = vadd.xlane.f32.xlu1 %v2403_v43 }
0x1bcd   :  { %v2402_v31 = vpop.xlane.xlu0 %2401 }
0x1bce   :  { %v2406_v44 = vmul.f32 0.03125, %v2402_v31 }
0x1bd0   :  { %v2408_v45 = vsub.f32 %v3983_v34, %v2406_v44  ;;  %v2521_v44 = vrot.slane %v3780_v42, %v1241_v61 }
0x1bd1   :  { %v2405_v4 = vpop.xlane.xlu1 %2404 }
0x1bd2   :  { %v2407_v41 = vmul.f32 0.03125, %v2405_v4  ;;  %v2410_v46 = vmul.f32 %v2408_v45, %v2408_v45 }
0x1bd4   :  { %v2409_v47 = vsub.f32 %v3988_v40, %v2407_v41  ;;  %v2412_v48 = vsel %vm92_vm1, %v2410_v46, 0.0 }
0x1bd5   :  { %2413 = vadd.xlane.f32.xlu0 %v2412_v48 }
0x1bd6   :  { %v2411_v60 = vmul.f32 %v2409_v47, %v2409_v47 }
0x1bd8   :  { %v2415_v10 = vsel %vm92_vm1, %v2411_v60, 0.0 }
0x1bd9   :  { %2416 = vadd.xlane.f32.xlu0 %v2415_v10 }
0x1c5e   :  { %v2414_v27 = vpop.xlane.xlu0 %2413 }
0x1c5f   :  { %v2418_v26 = vmul.f32 0.03125, %v2414_v27 }
0x1c61   :  { %v2420_v28 = vadd.f32 1e-06, %v2418_v26 }
0x1c62   :  { %v2417_v20 = vpop.xlane.xlu0 %2416 }
0x1c63   :  { %3330 = vrsqrt.f32 %v2420_v28  ;;  %v2419_v32 = vmul.f32 0.03125, %v2417_v20 }
0x1c65   :  { %v2421_v49 = vadd.f32 1e-06, %v2419_v32 }
0x1c67   :  { %3332 = vrsqrt.f32 %v2421_v49 }
0x1c70   :  { %v3331_v50 = vpop.eup %3330 }
0x1c71   :  { %v2424_v51 = vmul.f32 %v3331_v50, %v2408_v45  ;;  %v3385_v50 = vmov 0  }
0x1c72   :  { %3236 = vset.pattern.permute.xlu1 %v3385_v50  ;;  %3237 = vset.pattern.permute.xlu0 %v3385_v50 }
0x1c73   :  { %v2430_v55 = vmul.f32 %v2429_v53, %v2424_v51 }
0x1c74   :  { %v3333_v54 = vpop.eup %3332 }
0x1c75   :  { %v2425_v5 = vmul.f32 %v3333_v54, %v2409_v47  ;;  %v2436_v23 = vadd.f32 %v2435_v56, %v2430_v55 }
0x1c77   :  { %v2431_v2 = vmul.f32 %v2429_v53, %v2425_v5 }
0x1c79   :  { %v2437_v29 = vadd.f32 %v2435_v56, %v2431_v2 }
0x1c7b   :  { %v2438_v18 = vpack.c.bf16 %v2437_v29, %v2436_v23 }
0x1c7d   :  { %3165 = vmatmul.mubr.msk.bf16.vlgmr.msra.gmra.mxu1 %vm92_vm1, %v2438_v18 }
0x1c7e   :  { %3184 = vmatprep.mubr.msk.f32.mxu1 %vm3369_vm0, %v3368_v1 }
0x1d3d   :  { %v2492_v7 = vpop.f32.mrf.mxu1 }
0x1d3e   :  { %v2493_v30 = vadd.f32 %v2492_v7, %v2442_v0 }
0x1d3f   :  { %v3166_v8 = vpop.f32.mrf.mxu1 }
0x1d40   :  { %v2501_v9 = vmul.f32 %v2493_v30, %v2493_v30  ;;  %v2499_v35 = vmul.f32 0.5, %v2493_v30 }
0x1d41   :  { %v2495_v11 = vpop.f32.mrf.mxu1 }
0x1d42   :  { %v2503_v21 = vmul.f32 %v2501_v9, %v2493_v30  ;;  %v2496_v12 = vadd.f32 %v2495_v11, %v2442_v0 }
0x1d43   :  { %v3167_v14 = vpop.f32.mrf.mxu1 }
0x1d44   :  { %v2505_v52 = vmul.f32 0.044715, %v2503_v21  ;;  %v2502_v15 = vmul.f32 %v2496_v12, %v2496_v12  ;;  %v2500_v36 = vmul.f32 0.5, %v2496_v12 }
0x1d46   :  { %v2507_v16 = vadd.f32 %v2505_v52, %v2493_v30  ;;  %v2504_v19 = vmul.f32 %v2502_v15, %v2496_v12  ;;  %v2594_v30 = vld [vmem:[%s4070_s7 + $0x2] sm:$0x1] }
0x1d48   :  { %v2509_v22 = vmul.f32 0.7978846, %v2507_v16  ;;  %v2506_v24 = vmul.f32 0.044715, %v2504_v19 }
0x1d4a   :  { %3334 = vtanh.f32 %v2509_v22  ;;  %v2508_v58 = vadd.f32 %v2506_v24, %v2496_v12 }
0x1d4c   :  { %v2510_v17 = vmul.f32 0.7978846, %v2508_v58 }
0x1d4e   :  { %3336 = vtanh.f32 %v2510_v17 }
0x1d57   :  { %v3335_v57 = vpop.eup %3334 }
0x1d58   :  { %v2513_v37 = vadd.f32 1.0, %v3335_v57 }
0x1d5a   :  { %v2515_v38 = vmul.f32 %v2513_v37, %v2499_v35 }
0x1d5b   :  { %v3337_v33 = vpop.eup %3336 }
0x1d5c   :  { %v2514_v39 = vadd.f32 1.0, %v3337_v33 }
0x1d5e   :  { %v2516_v43 = vmul.f32 %v2514_v39, %v2500_v36 }
0x1d60   :  { %v2517_v31 = vpack.c.bf16 %v2516_v43, %v2515_v38 }
0x1d62   :  { %3177 = vmatmul.mubr.msk.bf16.vlgmr.msra.gmra.mxu0 %vm1267_vm6, %v2517_v31 }
0x1e22   :  { %v2583_v45 = vpop.f32.mrf.mxu0 }
0x1e23   :  { %v2584_v4 = vadd.f32 %v2583_v45, %v2521_v44 }
0x1e24   :  { %v3178_v41 = vpop.f32.mrf.mxu0 }
0x1e25   :  { %v2590_v46 = vadd.f32 %v2584_v4, %v3983_v34 }
0x1e26   :  { %v2586_v47 = vpop.f32.mrf.mxu0 }
0x1e27   :  { %v2587_v48 = vadd.f32 %v2586_v47, %v2521_v44  ;;  %v2596_v60 = vsel %vm92_vm1, %v2590_v46, 0.0 }
0x1e28   :  { %2597 = vadd.xlane.f32.xlu0 %v2596_v60  ;;  %v3179_v10 = vpop.f32.mrf.mxu0 }
0x1e29   :  { %v2591_v59 = vadd.f32 %v2587_v48, %v3988_v40  ;;  %v2595_v40 = vld [vmem:[%s4070_s7 + $0x3] sm:$0x1]  ;;  %s3346_s7 = scalar_lea.vmem %s2734_s1, 16 }
0x1e2a   :  { %p3347_p0 = scmp.ne.s32.totalorder %s2734_s1, %s3346_s7  ;;  %p3352_p2 = scmp.lt.s32.totalorder %s3350_s14, %s3346_s7 }
0x1e2b   :  { %v2599_v25 = vsel %vm92_vm1, %v2591_v59, 0.0 }
0x1e2c   :  { %2600 = vadd.xlane.f32.xlu1 %v2599_v25  ;;  %p3353_p3 = por %p3352_p2, %p3351_p1 }
0x1e2e   :  { %p3354_p4 = pnand %p3353_p3, %p3347_p0 }
0x1eb1   :  { %v2598_v27 = vpop.xlane.xlu0 %2597 }
0x1eb2   :  { %v2602_v3 = vmul.f32 0.03125, %v2598_v27 }
0x1eb4   :  { %v2604_v26 = vsub.f32 %v2590_v46, %v2602_v3 }
0x1eb5   :  { %v2601_v61 = vpop.xlane.xlu1 %2600 }
0x1eb6   :  { %v2603_v42 = vmul.f32 0.03125, %v2601_v61  ;;  %v2606_v28 = vmul.f32 %v2604_v26, %v2604_v26 }
0x1eb8   :  { %v2605_v20 = vsub.f32 %v2591_v59, %v2603_v42  ;;  %v2608_v34 = vsel %vm92_vm1, %v2606_v28, 0.0 }
0x1eb9   :  { %2609 = vadd.xlane.f32.xlu0 %v2608_v34 }
0x1eba   :  { %v2607_v32 = vmul.f32 %v2605_v20, %v2605_v20 }
0x1ebc   :  { %v2611_v49 = vsel %vm92_vm1, %v2607_v32, 0.0 }
0x1ebd   :  { %2612 = vadd.xlane.f32.xlu1 %v2611_v49 }
0x1ece   :  { %2636 = vperm.xlu1 %3236, %v2595_v40  }
0x1f42   :  { %v2610_v51 = vpop.xlane.xlu0 %2609 }
0x1f43   :  { %v2614_v53 = vmul.f32 0.03125, %v2610_v51 }
0x1f45   :  { %v2616_v54 = vadd.f32 1e-06, %v2614_v53 }
0x1f46   :  { %v2613_v5 = vpop.xlane.xlu1 %2612 }
0x1f47   :  { %v2615_v55 = vmul.f32 0.03125, %v2613_v5  ;;  %3338 = vrsqrt.f32 %v2616_v54 }
0x1f49   :  { %v2617_v56 = vadd.f32 1e-06, %v2615_v55 }
0x1f4a   :  { %v2637_v8 = vpop.permute.xlu1 %2636 }
0x1f4b   :  { %3340 = vrsqrt.f32 %v2617_v56 }
0x1f54   :  { %v3339_v2 = vpop.eup %3338 }
0x1f55   :  { %v2620_v29 = vmul.f32 %v3339_v2, %v2604_v26 }
0x1f57   :  { %v2626_v0 = vmul.f32 %v2816_v6, %v2620_v29 }
0x1f58   :  { %v3341_v23 = vpop.eup %3340 }
0x1f59   :  { %v2621_v18 = vmul.f32 %v3341_v23, %v2605_v20  ;;  %v2632_v7 = vadd.f32 %v2817_v62, %v2626_v0 }
0x1f5b   :  { %v2627_v13 = vmul.f32 %v2816_v6, %v2621_v18 }
0x1f5d   :  { %v2633_v63 = vadd.f32 %v2817_v62, %v2627_v13 }
0x1f5f   :  { %3181 = vmatpush3.xpose.msk.msra.mxu1 %vm92_vm1, %v2633_v63 }
0x1f60   :  { %3182 = vmatprep.subr.mxu1 %v3368_v1  ;;  %v2718_v1 = vld [vmem:[%s4065_s2] sm:$0x1] }
0x1f63   :  { %3183 = vmatpush3.xpose.msk.msra.mxu1 %vm92_vm1, %v2632_v7 }
0x1f66   :  { %3185 = vmatmul.mubr.msk.f32.vlgmr.msra.gmra.mxu1 %vm92_vm1, %v2594_v30 }
0x2026   :  { %v2714_v9 = vpop.f32.mrf.mxu1 }
0x2027   :  { %v2715_v11 = vadd.f32 %v2714_v9, %v2637_v8 }
0x2028   :  { %v3186_v21 = vpop.f32.mrf.mxu1 }
0x2029   :  { %v2719_v12 = vsub.f32 0.0, %v2715_v11 }
0x202b   :  { %v2720_v14 = vmul.f32 1.442695, %v2719_v12 }
0x202d   :  { %3342 = vpow2.f32 %v2720_v14 }
0x203a   :  { %v3343_v52 = vpop.eup %3342 }
0x203b   :  { %v2722_v15 = vadd.f32 1.0, %v3343_v52 }
0x203d   :  { %3344 = vrcp.f32 %v2722_v15 }
0x204a   :  { %v3345_v16 = vpop.eup %3344 }
0x204b   :  { %v2724_v19 = vmul.f32 %v3345_v16, %v2718_v1 }
0x204d   :  { %2726 = vst.msk [vmem:[#allocation2] sm:$0x1] %vm2725_vm7, %v2724_v19 }
0x204e   :  { %3357 = shalt.err (!%p3354_p4)
}
0x204f   :  { %2736 = dma.vmem_to_hbm [thread:$0]  %s2734_s1, 16, %s4071_s8, [#allocation3]  }
0x2050   :  { %3366 = dma.done.wait [#allocation3], 16  }
0x2051   :  { %3367 = vsyncadd [#allocation3], 4294967280 }
0x2052   :  { %2740 = vsyncpa [#allocation3], 1 }

</bundles_post_ra>
